<compile_context>
chip_gen: v7x
topology: tpu7x:2x2x1
jax: 0.10.0
libtpu: 0.0.40
codegen_flags: <defaults>
</compile_context>

<pallas_src>
import functools

import jax
import jax.numpy as jnp
import numpy as np
from jax.experimental import pallas as pl
from jax.experimental.pallas import tpu as pltpu


def _round_up(v, m):
    return (v + m - 1) // m * m


# ---------------------------------------------------------------------------
# Kernel: one LSTM layer, one grid step per chunk of timesteps.
# ---------------------------------------------------------------------------
def _lstm_layer_kernel(x_ref, wih_ref, whh_ref, b_ref, out_ref,
                       h_sc, c_sc, xp_sc, *, bp, steps):
    """x_ref: (steps*Bp, Dp)   wih_ref: (Dp, 4Hp)   whh_ref: (Hp, 4Hp)
    b_ref: (1, 4Hp)            out_ref: (steps*Bp, Hp)
    h_sc/c_sc: (Bp, Hp) f32 state carried across chunks.
    xp_sc: (steps*Bp, 4Hp) f32 precomputed input projection."""
    @pl.when(pl.program_id(0) == 0)
    def _():
        h_sc[...] = jnp.zeros_like(h_sc)
        c_sc[...] = jnp.zeros_like(c_sc)

    # Phase 1: one large MXU matmul for the entire chunk of timesteps
    # (steps*Bp rows at once), f32 accumulation, bias folded in here.
    xp_sc[...] = (
        jnp.dot(x_ref[...].astype(wih_ref.dtype), wih_ref[...],
                preferred_element_type=jnp.float32)
        + b_ref[...]
    )

    hp = h_sc.shape[1]
    whh = whh_ref[...]          # hoisted: resident in vregs/VMEM across steps

    # Phase 2: sequential recurrence — only the (Bp,Hp)@(Hp,4Hp) matmul per step.
    def step(t, carry):
        h, c = carry
        row = pl.multiple_of(t * bp, bp)
        gates = xp_sc[pl.ds(row, bp), :] + jnp.dot(
            h.astype(whh.dtype), whh, preferred_element_type=jnp.float32)
        # Gate blocks are each Hp (multiple of 128) wide -> lane-aligned slices.
        i = jax.nn.sigmoid(gates[:, 0 * hp:1 * hp])
        f = jax.nn.sigmoid(gates[:, 1 * hp:2 * hp])
        g = jnp.tanh(gates[:, 2 * hp:3 * hp])
        o = jax.nn.sigmoid(gates[:, 3 * hp:4 * hp])
        c_new = f * c + i * g
        h_new = o * jnp.tanh(c_new)
        out_ref[pl.ds(row, bp), :] = h_new.astype(out_ref.dtype)  # (8,128)-dense
        return h_new, c_new

    h_fin, c_fin = jax.lax.fori_loop(
        0, steps, step, (h_sc[...], c_sc[...]), unroll=min(steps, 8))
    h_sc[...] = h_fin
    c_sc[...] = c_fin


def _pick_time_chunk(seq_len, bp, dp, hp, budget_bytes=6 << 20):
    """Largest divisor of seq_len whose per-chunk VMEM buffers fit the budget."""
    best = 1
    for tc in range(1, seq_len + 1):
        if seq_len % tc:
            continue
        rows = tc * bp
        need = rows * (2 * dp * 4 + 2 * hp * 4 + 4 * hp * 4)  # x(in, 2buf) + out(2buf) + xp scratch
        if need <= budget_bytes:
            best = tc
    return best


def _lstm_layer_pallas(x_flat, w_ih_p, w_hh_p, bias_p, *, seq_len, bp):
    """x_flat: (seq_len*Bp, Dp) time-major/padded. Returns (seq_len*Bp, Hp) f32."""
    total_rows, dp = x_flat.shape
    hp = w_hh_p.shape[0]
    tc = _pick_time_chunk(seq_len, bp, dp, hp)
    n_chunks = seq_len // tc

    kernel = functools.partial(_lstm_layer_kernel, bp=bp, steps=tc)

    return pl.pallas_call(
        kernel,
        out_shape=jax.ShapeDtypeStruct((total_rows, hp), jnp.float32),
        grid_spec=pltpu.PrefetchScalarGridSpec(
            num_scalar_prefetch=0,
            grid=(n_chunks,),
            in_specs=[
                pl.BlockSpec((tc * bp, dp), lambda c: (c, 0)),
                pl.BlockSpec((dp, 4 * hp), lambda c: (0, 0)),
                pl.BlockSpec((hp, 4 * hp), lambda c: (0, 0)),
                pl.BlockSpec((1, 4 * hp), lambda c: (0, 0)),
            ],
            out_specs=pl.BlockSpec((tc * bp, hp), lambda c: (c, 0)),
            scratch_shapes=[
                pltpu.VMEM((bp, hp), jnp.float32),            # h state
                pltpu.VMEM((bp, hp), jnp.float32),            # c state
                pltpu.VMEM((tc * bp, 4 * hp), jnp.float32),   # x @ W_ih slab
            ],
        ),
        compiler_params=pltpu.CompilerParams(
            dimension_semantics=("arbitrary",)),   # time/chunk axis is sequential
    )(x_flat, w_ih_p, w_hh_p, bias_p)


# ---------------------------------------------------------------------------
# Weight packing: gate-blocked, lane-padded layout.
# ---------------------------------------------------------------------------
def _pack_gate_cols(w_t, rows_pad, h, hp):
    """w_t: (rows, 4h) [PyTorch i,f,g,o order] -> (rows_pad, 4hp), each gate
    occupying a lane-aligned block of hp columns (zeros elsewhere)."""
    rows = w_t.shape[0]
    out = jnp.zeros((rows_pad, 4 * hp), w_t.dtype)
    for k in range(4):
        out = out.at[:rows, k * hp:k * hp + h].set(w_t[:, k * h:(k + 1) * h])
    return out


def _pack_bias(b, h, hp):
    out = jnp.zeros((1, 4 * hp), jnp.float32)
    for k in range(4):
        out = out.at[0, k * hp:k * hp + h].set(b[k * h:(k + 1) * h])
    return out


# ---------------------------------------------------------------------------
# Full LSTMNet forward: x (B, S, D) -> (B*S, H)
# ---------------------------------------------------------------------------
def lstm_net_forward(x, params, compute_dtype=jnp.bfloat16):
    """params: list of dicts with 'w_ih' (4H, D_l), 'w_hh' (4H, H),
    'b_ih' (4H,), 'b_hh' (4H,) — PyTorch nn.LSTM conventions.
    compute_dtype controls the matmul operand dtype (accumulation stays f32)."""
    batch, seq_len, in_dim = x.shape
    hidden = params[0]["w_hh"].shape[1]
    bp = _round_up(batch, 8)       # sublane tile
    hp = _round_up(hidden, 128)    # lane tile
    dp = _round_up(in_dim, 128)

    # One transpose to time-major + explicit pad; stay in (S, Bp, *) throughout.
    xt = jnp.transpose(x, (1, 0, 2)).astype(jnp.float32)           # (S, B, D)
    xt = jnp.pad(xt, ((0, 0), (0, bp - batch), (0, dp - in_dim)))  # (S, Bp, Dp)
    h = xt.reshape(seq_len * bp, dp)

    for li, layer in enumerate(params):
        d_pad = dp if li == 0 else hp
        w_ih_p = _pack_gate_cols(
            jnp.transpose(layer["w_ih"]).astype(jnp.float32),
            d_pad, hidden, hp).astype(compute_dtype)
        w_hh_p = _pack_gate_cols(
            jnp.transpose(layer["w_hh"]).astype(jnp.float32),
            hp, hidden, hp).astype(compute_dtype)
        b_p = _pack_bias(
            (layer["b_ih"] + layer["b_hh"]).astype(jnp.float32), hidden, hp)
        h = _lstm_layer_pallas(h, w_ih_p, w_hh_p, b_p, seq_len=seq_len, bp=bp)

    out = h.reshape(seq_len, bp, hp)[:, :batch, :hidden]           # drop padding
    out = jnp.transpose(out, (1, 0, 2))                            # (B, S, H)
    return out.reshape(batch * seq_len, hidden)


# ---------------------------------------------------------------------------
# Params + pure-JAX reference (PyTorch LSTM semantics)
# ---------------------------------------------------------------------------
def init_lstm_params(key, input_size, hidden, num_layers):
    params = []
    scale = 1.0 / np.sqrt(hidden)
    for layer in range(num_layers):
        d_in = input_size if layer == 0 else hidden
        key, k1, k2, k3, k4 = jax.random.split(key, 5)
        params.append({
            "w_ih": jax.random.uniform(k1, (4 * hidden, d_in), jnp.float32, -scale, scale),
            "w_hh": jax.random.uniform(k2, (4 * hidden, hidden), jnp.float32, -scale, scale),
            "b_ih": jax.random.uniform(k3, (4 * hidden,), jnp.float32, -scale, scale),
            "b_hh": jax.random.uniform(k4, (4 * hidden,), jnp.float32, -scale, scale),
        })
    return params


def lstm_net_reference(x, params, compute_dtype=jnp.float32):
    """lax.scan reference. compute_dtype mirrors the kernel's matmul-operand
    dtype (f32 accumulation, f32 gate math / state)."""
    batch, seq_len, _ = x.shape
    h_seq = x.astype(jnp.float32)
    for layer in params:
        w_ih_t = jnp.transpose(layer["w_ih"]).astype(compute_dtype)
        w_hh_t = jnp.transpose(layer["w_hh"]).astype(compute_dtype)
        bias = (layer["b_ih"] + layer["b_hh"]).astype(jnp.float32)
        hidden = layer["w_hh"].shape[1]

        def step(carry, x_t, w_ih_t=w_ih_t, w_hh_t=w_hh_t, bias=bias):
            h, c = carry
            gates = (jnp.dot(x_t.astype(w_ih_t.dtype), w_ih_t,
                             preferred_element_type=jnp.float32)
                     + jnp.dot(h.astype(w_hh_t.dtype), w_hh_t,
                               preferred_element_type=jnp.float32)
                     + bias)
            i, f, g, o = jnp.split(gates, 4, axis=-1)
            i, f, o = jax.nn.sigmoid(i), jax.nn.sigmoid(f), jax.nn.sigmoid(o)
            g = jnp.tanh(g)
            c_new = f * c + i * g
            h_new = o * jnp.tanh(c_new)
            return (h_new, c_new), h_new

        init = (jnp.zeros((batch, hidden), jnp.float32),
                jnp.zeros((batch, hidden), jnp.float32))
        _, ys = jax.lax.scan(step, init, jnp.transpose(h_seq, (1, 0, 2)))
        h_seq = jnp.transpose(ys, (1, 0, 2))
    return h_seq.reshape(batch * seq_len, h_seq.shape[2])


if __name__ == "__main__":
    batch, seq_len, input_size, hidden, num_layers = 2, 8, 16, 32, 2

    key = jax.random.PRNGKey(0)
    key, kx = jax.random.split(key)
    x = jax.random.normal(kx, (batch, seq_len, input_size), jnp.float32)
    params = init_lstm_params(key, input_size, hidden, num_layers)

    # f32 path: matches the PyTorch-f32 LSTM semantics to tight tolerance.
    out_f32 = jax.block_until_ready(
        lstm_net_forward(x, params, compute_dtype=jnp.float32))
    ref_f32 = jax.block_until_ready(
        lstm_net_reference(x, params, compute_dtype=jnp.float32))
    assert out_f32.shape == (batch * seq_len, hidden), out_f32.shape
    np.testing.assert_allclose(np.asarray(out_f32), np.asarray(ref_f32),
                               rtol=2e-5, atol=2e-5)

    # bf16-operand path (perf default): compare against a reference using the
    # same bf16-operand / f32-accumulation recipe, plus a loose sanity check
    # against the exact f32 result.
    out_bf16 = jax.block_until_ready(
        lstm_net_forward(x, params, compute_dtype=jnp.bfloat16))
    ref_bf16 = jax.block_until_ready(
        lstm_net_reference(x, params, compute_dtype=jnp.bfloat16))
    np.testing.assert_allclose(np.asarray(out_bf16), np.asarray(ref_bf16),
                               rtol=1e-3, atol=1e-3)
    np.testing.assert_allclose(np.asarray(out_bf16), np.asarray(ref_f32),
                               rtol=1e-1, atol=1e-1)

    print("KERNEL_OK")
</pallas_src>

<mosaic_0001>
module attributes {stable_mosaic.version = 11 : i64} {
  func.func @_lstm_layer_kernel(%arg0: i32, %arg1: memref<64x128xf32, #tpu.memory_space<vmem>>, %arg2: memref<128x512xf32, #tpu.memory_space<vmem>>, %arg3: memref<128x512xf32, #tpu.memory_space<vmem>>, %arg4: memref<1x512xf32, #tpu.memory_space<vmem>>, %arg5: memref<64x128xf32, #tpu.memory_space<vmem>>, %arg6: memref<8x128xf32, #tpu.memory_space<vmem>>, %arg7: memref<8x128xf32, #tpu.memory_space<vmem>>, %arg8: memref<64x512xf32, #tpu.memory_space<vmem>>) attributes {dimension_semantics = [#tpu.dimension_semantics<arbitrary>], iteration_bounds = array<i64: 1>, scalar_prefetch = 0 : i64, scratch_operands = 3 : i64, tpu.core_type = #tpu.core_type<tc>, window_params = [{transform_indices = @transform_0, window_bounds = array<i64: 64, 128>}, {pipeline_mode = #tpu.pipeline_mode<synchronous>, transform_indices = @transform_1, window_bounds = array<i64: 128, 512>}, {pipeline_mode = #tpu.pipeline_mode<synchronous>, transform_indices = @transform_2, window_bounds = array<i64: 128, 512>}, {pipeline_mode = #tpu.pipeline_mode<synchronous>, transform_indices = @transform_3, window_bounds = array<i64: 1, 512>}, {transform_indices = @transform_4, window_bounds = array<i64: 64, 128>}]} {
    %c0_i32 = arith.constant 0 : i32
    %0 = arith.cmpi eq, %arg0, %c0_i32 : i32
    %1 = arith.extui %0 : i1 to i32
    %c0_i32_0 = arith.constant 0 : i32
    %2 = arith.cmpi ne, %1, %c0_i32_0 : i32
    scf.if %2 {
      %cst_75 = arith.constant 0.000000e+00 : f32
      %279 = vector.broadcast %cst_75 : f32 to vector<8x128xf32>
      %c0_76 = arith.constant 0 : index
      %c0_77 = arith.constant 0 : index
      %280 = vector.load %arg6[%c0_76, %c0_77] : memref<8x128xf32, #tpu.memory_space<vmem>>, vector<8x128xf32>
      tpu.vector_store %arg6[%c0_76, %c0_77], %279 {strides = array<i32>} : memref<8x128xf32, #tpu.memory_space<vmem>>, vector<8x128xf32>,
      %cst_78 = arith.constant 0.000000e+00 : f32
      %281 = vector.broadcast %cst_78 : f32 to vector<8x128xf32>
      %c0_79 = arith.constant 0 : index
      %c0_80 = arith.constant 0 : index
      %282 = vector.load %arg7[%c0_79, %c0_80] : memref<8x128xf32, #tpu.memory_space<vmem>>, vector<8x128xf32>
      tpu.vector_store %arg7[%c0_79, %c0_80], %281 {strides = array<i32>} : memref<8x128xf32, #tpu.memory_space<vmem>>, vector<8x128xf32>,
    } else {
    }
    %c0 = arith.constant 0 : index
    %c0_1 = arith.constant 0 : index
    %3 = vector.load %arg1[%c0, %c0_1] : memref<64x128xf32, #tpu.memory_space<vmem>>, vector<64x128xf32>
    %c0_2 = arith.constant 0 : index
    %c0_3 = arith.constant 0 : index
    %4 = vector.load %arg2[%c0_2, %c0_3] : memref<128x512xf32, #tpu.memory_space<vmem>>, vector<128x512xf32>
    %cst = arith.constant dense<0.000000e+00> : vector<64x512xf32>
    %5 = tpu.matmul %3, %4, %cst {dimension_numbers = #tpu.dot_dimension_numbers<[1], [0], [0], [1], [0, 0, 1, 1], [], []>} : vector<64x128xf32>, vector<128x512xf32>, vector<64x512xf32> -> vector<64x512xf32>
    %c0_4 = arith.constant 0 : index
    %c0_5 = arith.constant 0 : index
    %6 = vector.load %arg4[%c0_4, %c0_5] : memref<1x512xf32, #tpu.memory_space<vmem>>, vector<1x512xf32>
    %7 = vector.broadcast %6 : vector<1x512xf32> to vector<64x512xf32>
    %8 = arith.addf %5, %7 : vector<64x512xf32>
    %c0_6 = arith.constant 0 : index
    %c0_7 = arith.constant 0 : index
    %9 = vector.load %arg8[%c0_6, %c0_7] : memref<64x512xf32, #tpu.memory_space<vmem>>, vector<64x512xf32>
    tpu.vector_store %arg8[%c0_6, %c0_7], %8 {strides = array<i32>} : memref<64x512xf32, #tpu.memory_space<vmem>>, vector<64x512xf32>,
    %c0_8 = arith.constant 0 : index
    %c0_9 = arith.constant 0 : index
    %10 = vector.load %arg3[%c0_8, %c0_9] : memref<128x512xf32, #tpu.memory_space<vmem>>, vector<128x512xf32>
    %c0_10 = arith.constant 0 : index
    %c0_11 = arith.constant 0 : index
    %11 = vector.load %arg6[%c0_10, %c0_11] : memref<8x128xf32, #tpu.memory_space<vmem>>, vector<8x128xf32>
    %c0_12 = arith.constant 0 : index
    %c0_13 = arith.constant 0 : index
    %12 = vector.load %arg7[%c0_12, %c0_13] : memref<8x128xf32, #tpu.memory_space<vmem>>, vector<8x128xf32>
    %c0_i32_14 = arith.constant 0 : i32
    %c8_i32 = arith.constant 8 : i32
    %13 = arith.muli %c0_i32_14, %c8_i32 : i32
    %14 = tpu.assume_multiple %13, 8 : i32
    %15 = arith.index_cast %14 : i32 to index
    %c0_15 = arith.constant 0 : index
    %16 = vector.load %arg8[%15, %c0_15] : memref<64x512xf32, #tpu.memory_space<vmem>>, vector<8x512xf32>
    %cst_16 = arith.constant dense<0.000000e+00> : vector<8x512xf32>
    %17 = tpu.matmul %11, %10, %cst_16 {dimension_numbers = #tpu.dot_dimension_numbers<[1], [0], [0], [1], [0, 0, 1, 1], [], []>} : vector<8x128xf32>, vector<128x512xf32>, vector<8x512xf32> -> vector<8x512xf32>
    %18 = arith.addf %16, %17 : vector<8x512xf32>
    %19 = vector.extract_strided_slice %18 {offsets = [0, 0], sizes = [8, 128], strides = [1, 1]} : vector<8x512xf32> to vector<8x128xf32>
    %20 = arith.negf %19 : vector<8x128xf32>
    %21 = math.exp %20 : vector<8x128xf32>
    %cst_17 = arith.constant 1.000000e+00 : f32
    %22 = vector.broadcast %cst_17 : f32 to vector<8x128xf32>
    %23 = arith.addf %22, %21 : vector<8x128xf32>
    %24 = arith.divf %22, %23 : vector<8x128xf32>
    %25 = vector.extract_strided_slice %18 {offsets = [0, 128], sizes = [8, 128], strides = [1, 1]} : vector<8x512xf32> to vector<8x128xf32>
    %26 = arith.negf %25 : vector<8x128xf32>
    %27 = math.exp %26 : vector<8x128xf32>
    %cst_18 = arith.constant 1.000000e+00 : f32
    %28 = vector.broadcast %cst_18 : f32 to vector<8x128xf32>
    %29 = arith.addf %28, %27 : vector<8x128xf32>
    %30 = arith.divf %28, %29 : vector<8x128xf32>
    %31 = vector.extract_strided_slice %18 {offsets = [0, 256], sizes = [8, 128], strides = [1, 1]} : vector<8x512xf32> to vector<8x128xf32>
    %32 = math.tanh %31 : vector<8x128xf32>
    %33 = vector.extract_strided_slice %18 {offsets = [0, 384], sizes = [8, 128], strides = [1, 1]} : vector<8x512xf32> to vector<8x128xf32>
    %34 = arith.negf %33 : vector<8x128xf32>
    %35 = math.exp %34 : vector<8x128xf32>
    %cst_19 = arith.constant 1.000000e+00 : f32
    %36 = vector.broadcast %cst_19 : f32 to vector<8x128xf32>
    %37 = arith.addf %36, %35 : vector<8x128xf32>
    %38 = arith.divf %36, %37 : vector<8x128xf32>
    %39 = arith.mulf %30, %12 : vector<8x128xf32>
    %40 = arith.mulf %24, %32 : vector<8x128xf32>
    %41 = arith.addf %39, %40 : vector<8x128xf32>
    %42 = math.tanh %41 : vector<8x128xf32>
    %43 = arith.mulf %38, %42 : vector<8x128xf32>
    %44 = arith.index_cast %14 : i32 to index
    %c0_20 = arith.constant 0 : index
    %45 = vector.load %arg5[%44, %c0_20] : memref<64x128xf32, #tpu.memory_space<vmem>>, vector<8x128xf32>
    tpu.vector_store %arg5[%44, %c0_20], %43 {strides = array<i32>} : memref<64x128xf32, #tpu.memory_space<vmem>>, vector<8x128xf32>,
    %c1_i32 = arith.constant 1 : i32
    %c8_i32_21 = arith.constant 8 : i32
    %46 = arith.muli %c1_i32, %c8_i32_21 : i32
    %47 = tpu.assume_multiple %46, 8 : i32
    %48 = arith.index_cast %47 : i32 to index
    %c0_22 = arith.constant 0 : index
    %49 = vector.load %arg8[%48, %c0_22] : memref<64x512xf32, #tpu.memory_space<vmem>>, vector<8x512xf32>
    %cst_23 = arith.constant dense<0.000000e+00> : vector<8x512xf32>
    %50 = tpu.matmul %43, %10, %cst_23 {dimension_numbers = #tpu.dot_dimension_numbers<[1], [0], [0], [1], [0, 0, 1, 1], [], []>} : vector<8x128xf32>, vector<128x512xf32>, vector<8x512xf32> -> vector<8x512xf32>
    %51 = arith.addf %49, %50 : vector<8x512xf32>
    %52 = vector.extract_strided_slice %51 {offsets = [0, 0], sizes = [8, 128], strides = [1, 1]} : vector<8x512xf32> to vector<8x128xf32>
    %53 = arith.negf %52 : vector<8x128xf32>
    %54 = math.exp %53 : vector<8x128xf32>
    %cst_24 = arith.constant 1.000000e+00 : f32
    %55 = vector.broadcast %cst_24 : f32 to vector<8x128xf32>
    %56 = arith.addf %55, %54 : vector<8x128xf32>
    %57 = arith.divf %55, %56 : vector<8x128xf32>
    %58 = vector.extract_strided_slice %51 {offsets = [0, 128], sizes = [8, 128], strides = [1, 1]} : vector<8x512xf32> to vector<8x128xf32>
    %59 = arith.negf %58 : vector<8x128xf32>
    %60 = math.exp %59 : vector<8x128xf32>
    %cst_25 = arith.constant 1.000000e+00 : f32
    %61 = vector.broadcast %cst_25 : f32 to vector<8x128xf32>
    %62 = arith.addf %61, %60 : vector<8x128xf32>
    %63 = arith.divf %61, %62 : vector<8x128xf32>
    %64 = vector.extract_strided_slice %51 {offsets = [0, 256], sizes = [8, 128], strides = [1, 1]} : vector<8x512xf32> to vector<8x128xf32>
    %65 = math.tanh %64 : vector<8x128xf32>
    %66 = vector.extract_strided_slice %51 {offsets = [0, 384], sizes = [8, 128], strides = [1, 1]} : vector<8x512xf32> to vector<8x128xf32>
    %67 = arith.negf %66 : vector<8x128xf32>
    %68 = math.exp %67 : vector<8x128xf32>
    %cst_26 = arith.constant 1.000000e+00 : f32
    %69 = vector.broadcast %cst_26 : f32 to vector<8x128xf32>
    %70 = arith.addf %69, %68 : vector<8x128xf32>
    %71 = arith.divf %69, %70 : vector<8x128xf32>
    %72 = arith.mulf %63, %41 : vector<8x128xf32>
    %73 = arith.mulf %57, %65 : vector<8x128xf32>
    %74 = arith.addf %72, %73 : vector<8x128xf32>
    %75 = math.tanh %74 : vector<8x128xf32>
    %76 = arith.mulf %71, %75 : vector<8x128xf32>
    %77 = arith.index_cast %47 : i32 to index
    %c0_27 = arith.constant 0 : index
    %78 = vector.load %arg5[%77, %c0_27] : memref<64x128xf32, #tpu.memory_space<vmem>>, vector<8x128xf32>
    tpu.vector_store %arg5[%77, %c0_27], %76 {strides = array<i32>} : memref<64x128xf32, #tpu.memory_space<vmem>>, vector<8x128xf32>,
    %c2_i32 = arith.constant 2 : i32
    %c8_i32_28 = arith.constant 8 : i32
    %79 = arith.muli %c2_i32, %c8_i32_28 : i32
    %80 = tpu.assume_multiple %79, 8 : i32
    %81 = arith.index_cast %80 : i32 to index
    %c0_29 = arith.constant 0 : index
    %82 = vector.load %arg8[%81, %c0_29] : memref<64x512xf32, #tpu.memory_space<vmem>>, vector<8x512xf32>
    %cst_30 = arith.constant dense<0.000000e+00> : vector<8x512xf32>
    %83 = tpu.matmul %76, %10, %cst_30 {dimension_numbers = #tpu.dot_dimension_numbers<[1], [0], [0], [1], [0, 0, 1, 1], [], []>} : vector<8x128xf32>, vector<128x512xf32>, vector<8x512xf32> -> vector<8x512xf32>
    %84 = arith.addf %82, %83 : vector<8x512xf32>
    %85 = vector.extract_strided_slice %84 {offsets = [0, 0], sizes = [8, 128], strides = [1, 1]} : vector<8x512xf32> to vector<8x128xf32>
    %86 = arith.negf %85 : vector<8x128xf32>
    %87 = math.exp %86 : vector<8x128xf32>
    %cst_31 = arith.constant 1.000000e+00 : f32
    %88 = vector.broadcast %cst_31 : f32 to vector<8x128xf32>
    %89 = arith.addf %88, %87 : vector<8x128xf32>
    %90 = arith.divf %88, %89 : vector<8x128xf32>
    %91 = vector.extract_strided_slice %84 {offsets = [0, 128], sizes = [8, 128], strides = [1, 1]} : vector<8x512xf32> to vector<8x128xf32>
    %92 = arith.negf %91 : vector<8x128xf32>
    %93 = math.exp %92 : vector<8x128xf32>
    %cst_32 = arith.constant 1.000000e+00 : f32
    %94 = vector.broadcast %cst_32 : f32 to vector<8x128xf32>
    %95 = arith.addf %94, %93 : vector<8x128xf32>
    %96 = arith.divf %94, %95 : vector<8x128xf32>
    %97 = vector.extract_strided_slice %84 {offsets = [0, 256], sizes = [8, 128], strides = [1, 1]} : vector<8x512xf32> to vector<8x128xf32>
    %98 = math.tanh %97 : vector<8x128xf32>
    %99 = vector.extract_strided_slice %84 {offsets = [0, 384], sizes = [8, 128], strides = [1, 1]} : vector<8x512xf32> to vector<8x128xf32>
    %100 = arith.negf %99 : vector<8x128xf32>
    %101 = math.exp %100 : vector<8x128xf32>
    %cst_33 = arith.constant 1.000000e+00 : f32
    %102 = vector.broadcast %cst_33 : f32 to vector<8x128xf32>
    %103 = arith.addf %102, %101 : vector<8x128xf32>
    %104 = arith.divf %102, %103 : vector<8x128xf32>
    %105 = arith.mulf %96, %74 : vector<8x128xf32>
    %106 = arith.mulf %90, %98 : vector<8x128xf32>
    %107 = arith.addf %105, %106 : vector<8x128xf32>
    %108 = math.tanh %107 : vector<8x128xf32>
    %109 = arith.mulf %104, %108 : vector<8x128xf32>
    %110 = arith.index_cast %80 : i32 to index
    %c0_34 = arith.constant 0 : index
    %111 = vector.load %arg5[%110, %c0_34] : memref<64x128xf32, #tpu.memory_space<vmem>>, vector<8x128xf32>
    tpu.vector_store %arg5[%110, %c0_34], %109 {strides = array<i32>} : memref<64x128xf32, #tpu.memory_space<vmem>>, vector<8x128xf32>,
    %c3_i32 = arith.constant 3 : i32
    %c8_i32_35 = arith.constant 8 : i32
    %112 = arith.muli %c3_i32, %c8_i32_35 : i32
    %113 = tpu.assume_multiple %112, 8 : i32
    %114 = arith.index_cast %113 : i32 to index
    %c0_36 = arith.constant 0 : index
    %115 = vector.load %arg8[%114, %c0_36] : memref<64x512xf32, #tpu.memory_space<vmem>>, vector<8x512xf32>
    %cst_37 = arith.constant dense<0.000000e+00> : vector<8x512xf32>
    %116 = tpu.matmul %109, %10, %cst_37 {dimension_numbers = #tpu.dot_dimension_numbers<[1], [0], [0], [1], [0, 0, 1, 1], [], []>} : vector<8x128xf32>, vector<128x512xf32>, vector<8x512xf32> -> vector<8x512xf32>
    %117 = arith.addf %115, %116 : vector<8x512xf32>
    %118 = vector.extract_strided_slice %117 {offsets = [0, 0], sizes = [8, 128], strides = [1, 1]} : vector<8x512xf32> to vector<8x128xf32>
    %119 = arith.negf %118 : vector<8x128xf32>
    %120 = math.exp %119 : vector<8x128xf32>
    %cst_38 = arith.constant 1.000000e+00 : f32
    %121 = vector.broadcast %cst_38 : f32 to vector<8x128xf32>
    %122 = arith.addf %121, %120 : vector<8x128xf32>
    %123 = arith.divf %121, %122 : vector<8x128xf32>
    %124 = vector.extract_strided_slice %117 {offsets = [0, 128], sizes = [8, 128], strides = [1, 1]} : vector<8x512xf32> to vector<8x128xf32>
    %125 = arith.negf %124 : vector<8x128xf32>
    %126 = math.exp %125 : vector<8x128xf32>
    %cst_39 = arith.constant 1.000000e+00 : f32
    %127 = vector.broadcast %cst_39 : f32 to vector<8x128xf32>
    %128 = arith.addf %127, %126 : vector<8x128xf32>
    %129 = arith.divf %127, %128 : vector<8x128xf32>
    %130 = vector.extract_strided_slice %117 {offsets = [0, 256], sizes = [8, 128], strides = [1, 1]} : vector<8x512xf32> to vector<8x128xf32>
    %131 = math.tanh %130 : vector<8x128xf32>
    %132 = vector.extract_strided_slice %117 {offsets = [0, 384], sizes = [8, 128], strides = [1, 1]} : vector<8x512xf32> to vector<8x128xf32>
    %133 = arith.negf %132 : vector<8x128xf32>
    %134 = math.exp %133 : vector<8x128xf32>
    %cst_40 = arith.constant 1.000000e+00 : f32
    %135 = vector.broadcast %cst_40 : f32 to vector<8x128xf32>
    %136 = arith.addf %135, %134 : vector<8x128xf32>
    %137 = arith.divf %135, %136 : vector<8x128xf32>
    %138 = arith.mulf %129, %107 : vector<8x128xf32>
    %139 = arith.mulf %123, %131 : vector<8x128xf32>
    %140 = arith.addf %138, %139 : vector<8x128xf32>
    %141 = math.tanh %140 : vector<8x128xf32>
    %142 = arith.mulf %137, %141 : vector<8x128xf32>
    %143 = arith.index_cast %113 : i32 to index
    %c0_41 = arith.constant 0 : index
    %144 = vector.load %arg5[%143, %c0_41] : memref<64x128xf32, #tpu.memory_space<vmem>>, vector<8x128xf32>
    tpu.vector_store %arg5[%143, %c0_41], %142 {strides = array<i32>} : memref<64x128xf32, #tpu.memory_space<vmem>>, vector<8x128xf32>,
    %c4_i32 = arith.constant 4 : i32
    %c8_i32_42 = arith.constant 8 : i32
    %145 = arith.muli %c4_i32, %c8_i32_42 : i32
    %146 = tpu.assume_multiple %145, 8 : i32
    %147 = arith.index_cast %146 : i32 to index
    %c0_43 = arith.constant 0 : index
    %148 = vector.load %arg8[%147, %c0_43] : memref<64x512xf32, #tpu.memory_space<vmem>>, vector<8x512xf32>
    %cst_44 = arith.constant dense<0.000000e+00> : vector<8x512xf32>
    %149 = tpu.matmul %142, %10, %cst_44 {dimension_numbers = #tpu.dot_dimension_numbers<[1], [0], [0], [1], [0, 0, 1, 1], [], []>} : vector<8x128xf32>, vector<128x512xf32>, vector<8x512xf32> -> vector<8x512xf32>
    %150 = arith.addf %148, %149 : vector<8x512xf32>
    %151 = vector.extract_strided_slice %150 {offsets = [0, 0], sizes = [8, 128], strides = [1, 1]} : vector<8x512xf32> to vector<8x128xf32>
    %152 = arith.negf %151 : vector<8x128xf32>
    %153 = math.exp %152 : vector<8x128xf32>
    %cst_45 = arith.constant 1.000000e+00 : f32
    %154 = vector.broadcast %cst_45 : f32 to vector<8x128xf32>
    %155 = arith.addf %154, %153 : vector<8x128xf32>
    %156 = arith.divf %154, %155 : vector<8x128xf32>
    %157 = vector.extract_strided_slice %150 {offsets = [0, 128], sizes = [8, 128], strides = [1, 1]} : vector<8x512xf32> to vector<8x128xf32>
    %158 = arith.negf %157 : vector<8x128xf32>
    %159 = math.exp %158 : vector<8x128xf32>
    %cst_46 = arith.constant 1.000000e+00 : f32
    %160 = vector.broadcast %cst_46 : f32 to vector<8x128xf32>
    %161 = arith.addf %160, %159 : vector<8x128xf32>
    %162 = arith.divf %160, %161 : vector<8x128xf32>
    %163 = vector.extract_strided_slice %150 {offsets = [0, 256], sizes = [8, 128], strides = [1, 1]} : vector<8x512xf32> to vector<8x128xf32>
    %164 = math.tanh %163 : vector<8x128xf32>
    %165 = vector.extract_strided_slice %150 {offsets = [0, 384], sizes = [8, 128], strides = [1, 1]} : vector<8x512xf32> to vector<8x128xf32>
    %166 = arith.negf %165 : vector<8x128xf32>
    %167 = math.exp %166 : vector<8x128xf32>
    %cst_47 = arith.constant 1.000000e+00 : f32
    %168 = vector.broadcast %cst_47 : f32 to vector<8x128xf32>
    %169 = arith.addf %168, %167 : vector<8x128xf32>
    %170 = arith.divf %168, %169 : vector<8x128xf32>
    %171 = arith.mulf %162, %140 : vector<8x128xf32>
    %172 = arith.mulf %156, %164 : vector<8x128xf32>
    %173 = arith.addf %171, %172 : vector<8x128xf32>
    %174 = math.tanh %173 : vector<8x128xf32>
    %175 = arith.mulf %170, %174 : vector<8x128xf32>
    %176 = arith.index_cast %146 : i32 to index
    %c0_48 = arith.constant 0 : index
    %177 = vector.load %arg5[%176, %c0_48] : memref<64x128xf32, #tpu.memory_space<vmem>>, vector<8x128xf32>
    tpu.vector_store %arg5[%176, %c0_48], %175 {strides = array<i32>} : memref<64x128xf32, #tpu.memory_space<vmem>>, vector<8x128xf32>,
    %c5_i32 = arith.constant 5 : i32
    %c8_i32_49 = arith.constant 8 : i32
    %178 = arith.muli %c5_i32, %c8_i32_49 : i32
    %179 = tpu.assume_multiple %178, 8 : i32
    %180 = arith.index_cast %179 : i32 to index
    %c0_50 = arith.constant 0 : index
    %181 = vector.load %arg8[%180, %c0_50] : memref<64x512xf32, #tpu.memory_space<vmem>>, vector<8x512xf32>
    %cst_51 = arith.constant dense<0.000000e+00> : vector<8x512xf32>
    %182 = tpu.matmul %175, %10, %cst_51 {dimension_numbers = #tpu.dot_dimension_numbers<[1], [0], [0], [1], [0, 0, 1, 1], [], []>} : vector<8x128xf32>, vector<128x512xf32>, vector<8x512xf32> -> vector<8x512xf32>
    %183 = arith.addf %181, %182 : vector<8x512xf32>
    %184 = vector.extract_strided_slice %183 {offsets = [0, 0], sizes = [8, 128], strides = [1, 1]} : vector<8x512xf32> to vector<8x128xf32>
    %185 = arith.negf %184 : vector<8x128xf32>
    %186 = math.exp %185 : vector<8x128xf32>
    %cst_52 = arith.constant 1.000000e+00 : f32
    %187 = vector.broadcast %cst_52 : f32 to vector<8x128xf32>
    %188 = arith.addf %187, %186 : vector<8x128xf32>
    %189 = arith.divf %187, %188 : vector<8x128xf32>
    %190 = vector.extract_strided_slice %183 {offsets = [0, 128], sizes = [8, 128], strides = [1, 1]} : vector<8x512xf32> to vector<8x128xf32>
    %191 = arith.negf %190 : vector<8x128xf32>
    %192 = math.exp %191 : vector<8x128xf32>
    %cst_53 = arith.constant 1.000000e+00 : f32
    %193 = vector.broadcast %cst_53 : f32 to vector<8x128xf32>
    %194 = arith.addf %193, %192 : vector<8x128xf32>
    %195 = arith.divf %193, %194 : vector<8x128xf32>
    %196 = vector.extract_strided_slice %183 {offsets = [0, 256], sizes = [8, 128], strides = [1, 1]} : vector<8x512xf32> to vector<8x128xf32>
    %197 = math.tanh %196 : vector<8x128xf32>
    %198 = vector.extract_strided_slice %183 {offsets = [0, 384], sizes = [8, 128], strides = [1, 1]} : vector<8x512xf32> to vector<8x128xf32>
    %199 = arith.negf %198 : vector<8x128xf32>
    %200 = math.exp %199 : vector<8x128xf32>
    %cst_54 = arith.constant 1.000000e+00 : f32
    %201 = vector.broadcast %cst_54 : f32 to vector<8x128xf32>
    %202 = arith.addf %201, %200 : vector<8x128xf32>
    %203 = arith.divf %201, %202 : vector<8x128xf32>
    %204 = arith.mulf %195, %173 : vector<8x128xf32>
    %205 = arith.mulf %189, %197 : vector<8x128xf32>
    %206 = arith.addf %204, %205 : vector<8x128xf32>
    %207 = math.tanh %206 : vector<8x128xf32>
    %208 = arith.mulf %203, %207 : vector<8x128xf32>
    %209 = arith.index_cast %179 : i32 to index
    %c0_55 = arith.constant 0 : index
    %210 = vector.load %arg5[%209, %c0_55] : memref<64x128xf32, #tpu.memory_space<vmem>>, vector<8x128xf32>
    tpu.vector_store %arg5[%209, %c0_55], %208 {strides = array<i32>} : memref<64x128xf32, #tpu.memory_space<vmem>>, vector<8x128xf32>,
    %c6_i32 = arith.constant 6 : i32
    %c8_i32_56 = arith.constant 8 : i32
    %211 = arith.muli %c6_i32, %c8_i32_56 : i32
    %212 = tpu.assume_multiple %211, 8 : i32
    %213 = arith.index_cast %212 : i32 to index
    %c0_57 = arith.constant 0 : index
    %214 = vector.load %arg8[%213, %c0_57] : memref<64x512xf32, #tpu.memory_space<vmem>>, vector<8x512xf32>
    %cst_58 = arith.constant dense<0.000000e+00> : vector<8x512xf32>
    %215 = tpu.matmul %208, %10, %cst_58 {dimension_numbers = #tpu.dot_dimension_numbers<[1], [0], [0], [1], [0, 0, 1, 1], [], []>} : vector<8x128xf32>, vector<128x512xf32>, vector<8x512xf32> -> vector<8x512xf32>
    %216 = arith.addf %214, %215 : vector<8x512xf32>
    %217 = vector.extract_strided_slice %216 {offsets = [0, 0], sizes = [8, 128], strides = [1, 1]} : vector<8x512xf32> to vector<8x128xf32>
    %218 = arith.negf %217 : vector<8x128xf32>
    %219 = math.exp %218 : vector<8x128xf32>
    %cst_59 = arith.constant 1.000000e+00 : f32
    %220 = vector.broadcast %cst_59 : f32 to vector<8x128xf32>
    %221 = arith.addf %220, %219 : vector<8x128xf32>
    %222 = arith.divf %220, %221 : vector<8x128xf32>
    %223 = vector.extract_strided_slice %216 {offsets = [0, 128], sizes = [8, 128], strides = [1, 1]} : vector<8x512xf32> to vector<8x128xf32>
    %224 = arith.negf %223 : vector<8x128xf32>
    %225 = math.exp %224 : vector<8x128xf32>
    %cst_60 = arith.constant 1.000000e+00 : f32
    %226 = vector.broadcast %cst_60 : f32 to vector<8x128xf32>
    %227 = arith.addf %226, %225 : vector<8x128xf32>
    %228 = arith.divf %226, %227 : vector<8x128xf32>
    %229 = vector.extract_strided_slice %216 {offsets = [0, 256], sizes = [8, 128], strides = [1, 1]} : vector<8x512xf32> to vector<8x128xf32>
    %230 = math.tanh %229 : vector<8x128xf32>
    %231 = vector.extract_strided_slice %216 {offsets = [0, 384], sizes = [8, 128], strides = [1, 1]} : vector<8x512xf32> to vector<8x128xf32>
    %232 = arith.negf %231 : vector<8x128xf32>
    %233 = math.exp %232 : vector<8x128xf32>
    %cst_61 = arith.constant 1.000000e+00 : f32
    %234 = vector.broadcast %cst_61 : f32 to vector<8x128xf32>
    %235 = arith.addf %234, %233 : vector<8x128xf32>
    %236 = arith.divf %234, %235 : vector<8x128xf32>
    %237 = arith.mulf %228, %206 : vector<8x128xf32>
    %238 = arith.mulf %222, %230 : vector<8x128xf32>
    %239 = arith.addf %237, %238 : vector<8x128xf32>
    %240 = math.tanh %239 : vector<8x128xf32>
    %241 = arith.mulf %236, %240 : vector<8x128xf32>
    %242 = arith.index_cast %212 : i32 to index
    %c0_62 = arith.constant 0 : index
    %243 = vector.load %arg5[%242, %c0_62] : memref<64x128xf32, #tpu.memory_space<vmem>>, vector<8x128xf32>
    tpu.vector_store %arg5[%242, %c0_62], %241 {strides = array<i32>} : memref<64x128xf32, #tpu.memory_space<vmem>>, vector<8x128xf32>,
    %c7_i32 = arith.constant 7 : i32
    %c8_i32_63 = arith.constant 8 : i32
    %244 = arith.muli %c7_i32, %c8_i32_63 : i32
    %245 = tpu.assume_multiple %244, 8 : i32
    %246 = arith.index_cast %245 : i32 to index
    %c0_64 = arith.constant 0 : index
    %247 = vector.load %arg8[%246, %c0_64] : memref<64x512xf32, #tpu.memory_space<vmem>>, vector<8x512xf32>
    %cst_65 = arith.constant dense<0.000000e+00> : vector<8x512xf32>
    %248 = tpu.matmul %241, %10, %cst_65 {dimension_numbers = #tpu.dot_dimension_numbers<[1], [0], [0], [1], [0, 0, 1, 1], [], []>} : vector<8x128xf32>, vector<128x512xf32>, vector<8x512xf32> -> vector<8x512xf32>
    %249 = arith.addf %247, %248 : vector<8x512xf32>
    %250 = vector.extract_strided_slice %249 {offsets = [0, 0], sizes = [8, 128], strides = [1, 1]} : vector<8x512xf32> to vector<8x128xf32>
    %251 = arith.negf %250 : vector<8x128xf32>
    %252 = math.exp %251 : vector<8x128xf32>
    %cst_66 = arith.constant 1.000000e+00 : f32
    %253 = vector.broadcast %cst_66 : f32 to vector<8x128xf32>
    %254 = arith.addf %253, %252 : vector<8x128xf32>
    %255 = arith.divf %253, %254 : vector<8x128xf32>
    %256 = vector.extract_strided_slice %249 {offsets = [0, 128], sizes = [8, 128], strides = [1, 1]} : vector<8x512xf32> to vector<8x128xf32>
    %257 = arith.negf %256 : vector<8x128xf32>
    %258 = math.exp %257 : vector<8x128xf32>
    %cst_67 = arith.constant 1.000000e+00 : f32
    %259 = vector.broadcast %cst_67 : f32 to vector<8x128xf32>
    %260 = arith.addf %259, %258 : vector<8x128xf32>
    %261 = arith.divf %259, %260 : vector<8x128xf32>
    %262 = vector.extract_strided_slice %249 {offsets = [0, 256], sizes = [8, 128], strides = [1, 1]} : vector<8x512xf32> to vector<8x128xf32>
    %263 = math.tanh %262 : vector<8x128xf32>
    %264 = vector.extract_strided_slice %249 {offsets = [0, 384], sizes = [8, 128], strides = [1, 1]} : vector<8x512xf32> to vector<8x128xf32>
    %265 = arith.negf %264 : vector<8x128xf32>
    %266 = math.exp %265 : vector<8x128xf32>
    %cst_68 = arith.constant 1.000000e+00 : f32
    %267 = vector.broadcast %cst_68 : f32 to vector<8x128xf32>
    %268 = arith.addf %267, %266 : vector<8x128xf32>
    %269 = arith.divf %267, %268 : vector<8x128xf32>
    %270 = arith.mulf %261, %239 : vector<8x128xf32>
    %271 = arith.mulf %255, %263 : vector<8x128xf32>
    %272 = arith.addf %270, %271 : vector<8x128xf32>
    %273 = math.tanh %272 : vector<8x128xf32>
    %274 = arith.mulf %269, %273 : vector<8x128xf32>
    %275 = arith.index_cast %245 : i32 to index
    %c0_69 = arith.constant 0 : index
    %276 = vector.load %arg5[%275, %c0_69] : memref<64x128xf32, #tpu.memory_space<vmem>>, vector<8x128xf32>
    tpu.vector_store %arg5[%275, %c0_69], %274 {strides = array<i32>} : memref<64x128xf32, #tpu.memory_space<vmem>>, vector<8x128xf32>,
    %c8_i32_70 = arith.constant 8 : i32
    %c0_71 = arith.constant 0 : index
    %c0_72 = arith.constant 0 : index
    %277 = vector.load %arg6[%c0_71, %c0_72] : memref<8x128xf32, #tpu.memory_space<vmem>>, vector<8x128xf32>
    tpu.vector_store %arg6[%c0_71, %c0_72], %274 {strides = array<i32>} : memref<8x128xf32, #tpu.memory_space<vmem>>, vector<8x128xf32>,
    %c0_73 = arith.constant 0 : index
    %c0_74 = arith.constant 0 : index
    %278 = vector.load %arg7[%c0_73, %c0_74] : memref<8x128xf32, #tpu.memory_space<vmem>>, vector<8x128xf32>
    tpu.vector_store %arg7[%c0_73, %c0_74], %272 {strides = array<i32>} : memref<8x128xf32, #tpu.memory_space<vmem>>, vector<8x128xf32>,
    return
  }
  func.func @transform_0(%arg0: i32) -> (i32, i32) {
    %c0_i32 = arith.constant 0 : i32
    %c0_i32_0 = arith.constant 0 : i32
    return %arg0, %c0_i32 : i32, i32
  }
  func.func @transform_1(%arg0: i32) -> (i32, i32) {
    %c0_i32 = arith.constant 0 : i32
    %c0_i32_0 = arith.constant 0 : i32
    %c0_i32_1 = arith.constant 0 : i32
    return %c0_i32, %c0_i32_0 : i32, i32
  }
  func.func @transform_2(%arg0: i32) -> (i32, i32) {
    %c0_i32 = arith.constant 0 : i32
    %c0_i32_0 = arith.constant 0 : i32
    %c0_i32_1 = arith.constant 0 : i32
    return %c0_i32, %c0_i32_0 : i32, i32
  }
  func.func @transform_3(%arg0: i32) -> (i32, i32) {
    %c0_i32 = arith.constant 0 : i32
    %c0_i32_0 = arith.constant 0 : i32
    %c0_i32_1 = arith.constant 0 : i32
    return %c0_i32, %c0_i32_0 : i32, i32
  }
  func.func @transform_4(%arg0: i32) -> (i32, i32) {
    %c0_i32 = arith.constant 0 : i32
    %c0_i32_0 = arith.constant 0 : i32
    return %arg0, %c0_i32 : i32, i32
  }
}

</mosaic_0001>

<bundles_post_ra>
// kernel: tpu_custom_call.1
= control target key start
LH: loop header
LB: loop body
LE: loop exit
PB: predicated region body
PF: predicated region fallthrough
CT: control target
= control target key end

     0   :  { %9 = vsyncpa [#allocation6], 0  ;;  %s3351_s0 = inlined_call_operand.hbm [shape: f32[64,128], index: 0, kind: input, shape index: {}]   ;;  %s3352_s1 = inlined_call_operand.hbm [shape: f32[128,512], index: 1, kind: input, shape index: {}]   ;;  %s3353_s2 = inlined_call_operand.hbm [shape: f32[128,512], index: 2, kind: input, shape index: {}]   ;;  %s3354_s3 = inlined_call_operand.vmem [shape: f32[1,512], index: 3, kind: input, shape index: {}]   ;;  %s3355_s4 = inlined_call_operand.hbm [shape: f32[64,128], index: 4, kind: output, shape index: {}]  }
   0x1   :  { %10 = vsyncpa [#allocation9], 0 }
   0x2   :  { %11 = vsyncpa [#allocation7], 0  ;;  %s2836_s15 = smov [#allocation8]   ;;  %s2742_s19 = scalar_lea.hbm %s3352_s1, 8192 }
   0x3   :  { %s29_s16 = sshll.u32 %s2836_s15, 4  ;;  %p2743_p0 = scmp.ne.s32.totalorder %s3352_s1, %s2742_s19  ;;  %s30_s16 = int_to_ptr.vmem [resolvable:$true] %s29_s16 }
   0x4   :  { %p2746_p1 = scmp.lt.u32.totalorder %s2742_s19, %s3352_s1 }
   0x6   :  { %p2748_p2 = pnand %p2746_p1, %p2743_p0 }
   0x8   :  { %2751 = shalt.err (!%p2748_p2)
}
   0x9   :  { %s2752_s24 = scalar_lea.vmem %s30_s16, 8192  ;;  %p2757_p4 = scmp.lt.s32.totalorder %s30_s16, %s30_s16 }
   0xa   :  { %p2753_p3 = scmp.ne.s32.totalorder %s30_s16, %s2752_s24  ;;  %p2758_p5 = scmp.lt.s32.totalorder %s2752_s24, %s2752_s24 }
   0xc   :  { %p2759_p6 = por %p2758_p5, %p2757_p4 }
   0xe   :  { %p2760_p7 = pnand %p2759_p6, %p2753_p3 }
  0x10   :  { %2763 = shalt.err (!%p2760_p7)
}
  0x11   :  { %s2837_s25 = smov 512   ;;  %s2838_s26 = smov 32  }
  0x12   :  { %35 = dma.hbm_to_vmem [thread:$0]  %s3352_s1, 8192, %s30_s16, [#allocation9], %s2837_s25, %s2837_s25, %s2838_s26  }
  0x13   :  { %s2839_s29 = smov [#allocation5]   ;;  %s2764_s7 = scalar_lea.hbm %s3351_s0, 1024 }
  0x14   :  { %s17_s30 = sshll.u32 %s2839_s29, 4  ;;  %p2765_p8 = scmp.ne.s32.totalorder %s3351_s0, %s2764_s7  ;;  %s18_s30 = int_to_ptr.vmem [resolvable:$true] %s17_s30 }
  0x15   :  { %p2768_p9 = scmp.lt.u32.totalorder %s2764_s7, %s3351_s0 }
  0x17   :  { %p2770_p10 = pnand %p2768_p9, %p2765_p8 }
  0x19   :  { %2773 = shalt.err (!%p2770_p10)
}
  0x1a   :  { %s2774_s12 = scalar_lea.vmem %s18_s30, 1024  ;;  %p2779_p12 = scmp.lt.s32.totalorder %s18_s30, %s18_s30 }
  0x1b   :  { %p2775_p11 = scmp.ne.s32.totalorder %s18_s30, %s2774_s12  ;;  %p2780_p13 = scmp.lt.s32.totalorder %s2774_s12, %s2774_s12 }
  0x1d   :  { %p2781_p0 = por %p2780_p13, %p2779_p12 }
  0x1f   :  { %p2782_p1 = pnand %p2781_p0, %p2775_p11 }
  0x21   :  { %2785 = shalt.err (!%p2782_p1)
}
  0x22   :  { %s2840_s1 = smov 128   ;;  %s2841_s13 = smov 8  }
  0x23   :  { %23 = dma.hbm_to_vmem [thread:$0]  %s3351_s0, 1024, %s18_s30, [#allocation6], %s2840_s1, %s2840_s1, %s2841_s13  }
  0x24   :  { %s2842_s16 = smov [#allocation10]   ;;  %s2786_s20 = scalar_lea.hbm %s3353_s2, 8192 }
  0x25   :  { %s41_s17 = sshll.u32 %s2842_s16, 4  ;;  %p2787_p2 = scmp.ne.s32.totalorder %s3353_s2, %s2786_s20  ;;  %s42_s17 = int_to_ptr.vmem [resolvable:$true] %s41_s17 }
  0x26   :  { %p2790_p3 = scmp.lt.u32.totalorder %s2786_s20, %s3353_s2 }
  0x28   :  { %p2792_p4 = pnand %p2790_p3, %p2787_p2 }
  0x2a   :  { %2795 = shalt.err (!%p2792_p4)
}
  0x2b   :  { %s2796_s27 = scalar_lea.vmem %s42_s17, 8192  ;;  %p2801_p6 = scmp.lt.s32.totalorder %s42_s17, %s42_s17 }
  0x2c   :  { %p2797_p5 = scmp.ne.s32.totalorder %s42_s17, %s2796_s27  ;;  %p2802_p7 = scmp.lt.s32.totalorder %s2796_s27, %s2796_s27 }
  0x2e   :  { %p2803_p8 = por %p2802_p7, %p2801_p6 }
  0x30   :  { %p2804_p9 = pnand %p2803_p8, %p2797_p5 }
  0x32   :  { %2807 = shalt.err (!%p2804_p9)
}
  0x33   :  { %47 = dma.hbm_to_vmem [thread:$0]  %s3353_s2, 8192, %s42_s17, [#allocation9], %s2837_s25, %s2837_s25, %s2838_s26  }
  0x34   :  { %2830 = dma.done.wait [#allocation6], 1024  }
  0x35   :  { %2831 = vsyncadd [#allocation6], 4294966272 }
  0x36   :  { %2832 = dma.done.wait [#allocation9], 16384  }
  0x37   :  { %2833 = vsyncadd [#allocation9], 4294950912  ;;  %v2843_v0 = vmov 0.0   ;;  %v74_v1 = vld [vmem:[#allocation8 + $0x8] sm:$0xff]  ;;  %v76_v3 = vld [vmem:[#allocation8 + $0x18] sm:$0xff] }
  0x38   :  { %223 = vmatprep.mubr.f32.mxu0 %v2843_v0  ;;  %336 = vmatprep.mubr.f32.mxu1 %v2843_v0  ;;  %v78_v2 = vld [vmem:[#allocation8 + $0x28] sm:$0xff]  ;;  %v80_v5 = vld [vmem:[#allocation8 + $0x38] sm:$0xff]  ;;  %v73_v6 = vld [vmem:[#allocation8] sm:$0xff] }
  0x39   :  { %v1965_v4 = vpack.c.bf16 %v78_v2, %v74_v1  ;;  %v77_v7 = vld [vmem:[#allocation8 + $0x20] sm:$0xff]  ;;  %v1997_v8 = vpack.c.bf16 %v80_v5, %v76_v3  ;;  %v75_v10 = vld [vmem:[#allocation8 + $0x10] sm:$0xff]  ;;  %v82_v12 = vld [vmem:[#allocation8 + $0x48] sm:$0xff] }
  0x3a   :  { %v1967_v9 = vpack.c.bf16 %v77_v7, %v73_v6  ;;  %v79_v11 = vld [vmem:[#allocation8 + $0x30] sm:$0xff]  ;;  %v86_v14 = vld [vmem:[#allocation8 + $0x68] sm:$0xff]  ;;  %v84_v15 = vld [vmem:[#allocation8 + $0x58] sm:$0xff] }
  0x3b   :  { %1966 = vmatprep.subr.bf16.mxu0 %v1965_v4  ;;  %v1999_v13 = vpack.c.bf16 %v79_v11, %v75_v10  ;;  %v88_v16 = vld [vmem:[#allocation8 + $0x78] sm:$0xff]  ;;  %1998 = vmatprep.subr.bf16.mxu1 %v1997_v8  ;;  %v1969_v17 = vpack.c.bf16 %v86_v14, %v82_v12  ;;  %v81_v19 = vld [vmem:[#allocation8 + $0x40] sm:$0xff]  ;;  %v83_v21 = vld [vmem:[#allocation8 + $0x50] sm:$0xff] }
  0x3c   :  { %1968 = vmatpush1.bf16.msra.mxu0 %v1967_v9  ;;  %v2001_v18 = vpack.c.bf16 %v88_v16, %v84_v15  ;;  %v85_v20 = vld [vmem:[#allocation8 + $0x60] sm:$0xff]  ;;  %v87_v23 = vld [vmem:[#allocation8 + $0x70] sm:$0xff]  ;;  %v90_v24 = vld [vmem:[#allocation8 + $0x88] sm:$0xff] }
  0x3d   :  { %2000 = vmatpush1.bf16.msra.mxu1 %v1999_v13  ;;  %v1971_v22 = vpack.c.bf16 %v85_v20, %v81_v19  ;;  %v94_v25 = vld [vmem:[#allocation8 + $0xa8] sm:$0xff]  ;;  %1970 = vmatprep.subr.bf16.mxu0 %v1969_v17  ;;  %v2003_v26 = vpack.c.bf16 %v87_v23, %v83_v21  ;;  %v92_v28 = vld [vmem:[#allocation8 + $0x98] sm:$0xff]  ;;  %v89_v30 = vld [vmem:[#allocation8 + $0x80] sm:$0xff] }
  0x3e   :  { %2002 = vmatprep.subr.bf16.mxu1 %v2001_v18  ;;  %v1973_v27 = vpack.c.bf16 %v94_v25, %v90_v24  ;;  %v96_v29 = vld [vmem:[#allocation8 + $0xb8] sm:$0xff]  ;;  %v93_v32 = vld [vmem:[#allocation8 + $0xa0] sm:$0xff]  ;;  %v91_v33 = vld [vmem:[#allocation8 + $0x90] sm:$0xff] }
  0x3f   :  { %v2005_v31 = vpack.c.bf16 %v96_v29, %v92_v28  ;;  %v95_v34 = vld [vmem:[#allocation8 + $0xb0] sm:$0xff]  ;;  %v1975_v35 = vpack.c.bf16 %v93_v32, %v89_v30  ;;  %v98_v36 = vld [vmem:[#allocation8 + $0xc8] sm:$0xff]  ;;  %v100_v38 = vld [vmem:[#allocation8 + $0xd8] sm:$0xff] }
  0x40   :  { %1972 = vmatpush1.bf16.msra.mxu0 %v1971_v22  ;;  %v102_v37 = vld [vmem:[#allocation8 + $0xe8] sm:$0xff]  ;;  %v2007_v39 = vpack.c.bf16 %v95_v34, %v91_v33  ;;  %v104_v41 = vld [vmem:[#allocation8 + $0xf8] sm:$0xff]  ;;  %v97_v42 = vld [vmem:[#allocation8 + $0xc0] sm:$0xff] }
  0x41   :  { %2004 = vmatpush1.bf16.msra.mxu1 %v2003_v26  ;;  %1974 = vmatprep.subr.bf16.mxu0 %v1973_v27  ;;  %v1977_v40 = vpack.c.bf16 %v102_v37, %v98_v36  ;;  %v101_v43 = vld [vmem:[#allocation8 + $0xe0] sm:$0xff]  ;;  %v2009_v44 = vpack.c.bf16 %v104_v41, %v100_v38  ;;  %v99_v45 = vld [vmem:[#allocation8 + $0xd0] sm:$0xff]  ;;  %v106_v47 = vld [vmem:[#allocation8 + $0x108] sm:$0xff] }
  0x42   :  { %2006 = vmatprep.subr.bf16.mxu1 %v2005_v31  ;;  %v103_v46 = vld [vmem:[#allocation8 + $0xf0] sm:$0xff]  ;;  %v110_v48 = vld [vmem:[#allocation8 + $0x128] sm:$0xff]  ;;  %v108_v49 = vld [vmem:[#allocation8 + $0x118] sm:$0xff]  ;;  %v1979_v51 = vpack.c.bf16 %v101_v43, %v97_v42 }
  0x43   :  { %v112_v50 = vld [vmem:[#allocation8 + $0x138] sm:$0xff]  ;;  %v2011_v52 = vpack.c.bf16 %v103_v46, %v99_v45  ;;  %v1981_v53 = vpack.c.bf16 %v110_v48, %v106_v47  ;;  %v105_v54 = vld [vmem:[#allocation8 + $0x100] sm:$0xff]  ;;  %v107_v56 = vld [vmem:[#allocation8 + $0x110] sm:$0xff] }
  0x44   :  { %1976 = vmatpush1.bf16.msra.mxu0 %v1975_v35  ;;  %v109_v55 = vld [vmem:[#allocation8 + $0x120] sm:$0xff]  ;;  %v2013_v57 = vpack.c.bf16 %v112_v50, %v108_v49  ;;  %v111_v58 = vld [vmem:[#allocation8 + $0x130] sm:$0xff]  ;;  %v114_v59 = vld [vmem:[#allocation8 + $0x148] sm:$0xff] }
  0x45   :  { %2008 = vmatpush1.bf16.msra.mxu1 %v2007_v39  ;;  %1978 = vmatprep.subr.bf16.mxu0 %v1977_v40  ;;  %v118_v60 = vld [vmem:[#allocation8 + $0x168] sm:$0xff]  ;;  %v116_v61 = vld [vmem:[#allocation8 + $0x158] sm:$0xff]  ;;  %v1983_v63 = vpack.c.bf16 %v109_v55, %v105_v54  ;;  %v2015_v1 = vpack.c.bf16 %v111_v58, %v107_v56  ;;  %v113_v3 = vld [vmem:[#allocation8 + $0x140] sm:$0xff] }
  0x46   :  { %2010 = vmatprep.subr.bf16.mxu1 %v2009_v44  ;;  %v120_v62 = vld [vmem:[#allocation8 + $0x178] sm:$0xff]  ;;  %v1985_v2 = vpack.c.bf16 %v118_v60, %v114_v59  ;;  %v117_v4 = vld [vmem:[#allocation8 + $0x160] sm:$0xff]  ;;  %v115_v5 = vld [vmem:[#allocation8 + $0x150] sm:$0xff] }
  0x47   :  { %v2017_v6 = vpack.c.bf16 %v120_v62, %v116_v61  ;;  %v119_v7 = vld [vmem:[#allocation8 + $0x170] sm:$0xff]  ;;  %v122_v8 = vld [vmem:[#allocation8 + $0x188] sm:$0xff]  ;;  %v124_v10 = vld [vmem:[#allocation8 + $0x198] sm:$0xff]  ;;  %v1987_v12 = vpack.c.bf16 %v117_v4, %v113_v3 }
  0x48   :  { %1980 = vmatpush1.bf16.msra.mxu0 %v1979_v51  ;;  %v126_v9 = vld [vmem:[#allocation8 + $0x1a8] sm:$0xff]  ;;  %v128_v11 = vld [vmem:[#allocation8 + $0x1b8] sm:$0xff]  ;;  %v2019_v13 = vpack.c.bf16 %v119_v7, %v115_v5  ;;  %v121_v15 = vld [vmem:[#allocation8 + $0x180] sm:$0xff] }
  0x49   :  { %2012 = vmatpush1.bf16.msra.mxu1 %v2011_v52  ;;  %1982 = vmatprep.subr.bf16.mxu0 %v1981_v53  ;;  %v1989_v14 = vpack.c.bf16 %v126_v9, %v122_v8  ;;  %v125_v16 = vld [vmem:[#allocation8 + $0x1a0] sm:$0xff]  ;;  %v123_v17 = vld [vmem:[#allocation8 + $0x190] sm:$0xff]  ;;  %v2021_v18 = vpack.c.bf16 %v128_v11, %v124_v10  ;;  %v130_v20 = vld [vmem:[#allocation8 + $0x1c8] sm:$0xff] }
  0x4a   :  { %2014 = vmatprep.subr.bf16.mxu1 %v2013_v57  ;;  %v127_v19 = vld [vmem:[#allocation8 + $0x1b0] sm:$0xff]  ;;  %v134_v21 = vld [vmem:[#allocation8 + $0x1e8] sm:$0xff]  ;;  %v132_v22 = vld [vmem:[#allocation8 + $0x1d8] sm:$0xff]  ;;  %v1991_v24 = vpack.c.bf16 %v125_v16, %v121_v15 }
  0x4b   :  { %v136_v23 = vld [vmem:[#allocation8 + $0x1f8] sm:$0xff]  ;;  %v2023_v25 = vpack.c.bf16 %v127_v19, %v123_v17  ;;  %v1993_v26 = vpack.c.bf16 %v134_v21, %v130_v20  ;;  %v129_v27 = vld [vmem:[#allocation8 + $0x1c0] sm:$0xff]  ;;  %v131_v29 = vld [vmem:[#allocation8 + $0x1d0] sm:$0xff] }
  0x4c   :  { %1984 = vmatpush1.bf16.msra.mxu0 %v1983_v63  ;;  %v133_v28 = vld [vmem:[#allocation8 + $0x1e0] sm:$0xff]  ;;  %v2025_v30 = vpack.c.bf16 %v136_v23, %v132_v22  ;;  %v135_v31 = vld [vmem:[#allocation8 + $0x1f0] sm:$0xff]  ;;  %v418_v32 = vld [vmem:[#allocation10 + $0x8] sm:$0xff] }
  0x4d   :  { %2016 = vmatpush1.bf16.msra.mxu1 %v2015_v1  ;;  %1986 = vmatprep.subr.bf16.mxu0 %v1985_v2  ;;  %v422_v33 = vld [vmem:[#allocation10 + $0x28] sm:$0xff]  ;;  %v420_v34 = vld [vmem:[#allocation10 + $0x18] sm:$0xff]  ;;  %v1995_v36 = vpack.c.bf16 %v133_v28, %v129_v27  ;;  %v2027_v37 = vpack.c.bf16 %v135_v31, %v131_v29  ;;  %v417_v39 = vld [vmem:[#allocation10] sm:$0xff] }
  0x4e   :  { %2018 = vmatprep.subr.bf16.mxu1 %v2017_v6  ;;  %v424_v35 = vld [vmem:[#allocation10 + $0x38] sm:$0xff]  ;;  %v2917_v38 = vpack.c.bf16 %v422_v33, %v418_v32  ;;  %v421_v40 = vld [vmem:[#allocation10 + $0x20] sm:$0xff]  ;;  %v419_v42 = vld [vmem:[#allocation10 + $0x10] sm:$0xff] }
  0x4f   :  { %v2919_v41 = vpack.c.bf16 %v424_v35, %v420_v34  ;;  %v423_v43 = vld [vmem:[#allocation10 + $0x30] sm:$0xff]  ;;  %v426_v44 = vld [vmem:[#allocation10 + $0x48] sm:$0xff]  ;;  %v65_v46 = vld [vmem:[#allocation5] sm:$0xff]  ;;  %v2921_v47 = vpack.c.bf16 %v421_v40, %v417_v39 }
  0x50   :  { %1988 = vmatpush1.bf16.msra.mxu0 %v1987_v12  ;;  %v430_v45 = vld [vmem:[#allocation10 + $0x68] sm:$0xff]  ;;  %v428_v48 = vld [vmem:[#allocation10 + $0x58] sm:$0xff]  ;;  %v2924_v50 = vpack.c.bf16 %v423_v43, %v419_v42  ;;  %v425_v51 = vld [vmem:[#allocation10 + $0x40] sm:$0xff] }
  0x51   :  { %2020 = vmatpush1.bf16.msra.mxu1 %v2019_v13  ;;  %1990 = vmatprep.subr.bf16.mxu0 %v1989_v14  ;;  %v432_v49 = vld [vmem:[#allocation10 + $0x78] sm:$0xff]  ;;  %v429_v52 = vld [vmem:[#allocation10 + $0x60] sm:$0xff]  ;;  %v2927_v53 = vpack.c.bf16 %v430_v45, %v426_v44  ;;  %v427_v54 = vld [vmem:[#allocation10 + $0x50] sm:$0xff] }
  0x52   :  { %2022 = vmatprep.subr.bf16.mxu1 %v2021_v18  ;;  %v431_v55 = vld [vmem:[#allocation10 + $0x70] sm:$0xff]  ;;  %v2929_v56 = vpack.c.bf16 %v432_v49, %v428_v48  ;;  %v434_v57 = vld [vmem:[#allocation10 + $0x88] sm:$0xff]  ;;  %v2932_v60 = vpack.c.bf16 %v429_v52, %v425_v51  ;;  %v436_v61 = vld [vmem:[#allocation10 + $0x98] sm:$0xff] }
  0x53   :  { %v438_v58 = vld [vmem:[#allocation10 + $0xa8] sm:$0xff]  ;;  %v440_v62 = vld [vmem:[#allocation10 + $0xb8] sm:$0xff]  ;;  %v2936_v63 = vpack.c.bf16 %v431_v55, %v427_v54  ;;  %v433_v1 = vld [vmem:[#allocation10 + $0x80] sm:$0xff] }
  0x54   :  { %1992 = vmatpush1.bf16.msra.mxu0 %v1991_v24  ;;  %v66_v59 = vld [vmem:[#allocation5 + $0x8] sm:$0xff]  ;;  %v437_v2 = vld [vmem:[#allocation10 + $0xa0] sm:$0xff]  ;;  %v2940_v3 = vpack.c.bf16 %v438_v58, %v434_v57  ;;  %v435_v4 = vld [vmem:[#allocation10 + $0x90] sm:$0xff]  ;;  %v2943_v6 = vpack.c.bf16 %v440_v62, %v436_v61 }
  0x55   :  { %2024 = vmatpush1.bf16.msra.mxu1 %v2023_v25  ;;  %1994 = vmatprep.subr.bf16.mxu0 %v1993_v26  ;;  %v439_v5 = vld [vmem:[#allocation10 + $0xb0] sm:$0xff]  ;;  %v442_v7 = vld [vmem:[#allocation10 + $0xc8] sm:$0xff]  ;;  %v2946_v10 = vpack.c.bf16 %v437_v2, %v433_v1  ;;  %v444_v11 = vld [vmem:[#allocation10 + $0xd8] sm:$0xff] }
  0x56   :  { %2026 = vmatprep.subr.bf16.mxu1 %v2025_v30  ;;  %v446_v8 = vld [vmem:[#allocation10 + $0xe8] sm:$0xff]  ;;  %v67_v9 = vld [vmem:[#allocation5 + $0x10] sm:$0xff]  ;;  %v448_v12 = vld [vmem:[#allocation10 + $0xf8] sm:$0xff]  ;;  %v2950_v13 = vpack.c.bf16 %v439_v5, %v435_v4 }
  0x57   :  { %v441_v14 = vld [vmem:[#allocation10 + $0xc0] sm:$0xff]  ;;  %v2954_v16 = vpack.c.bf16 %v446_v8, %v442_v7  ;;  %v443_v17 = vld [vmem:[#allocation10 + $0xd0] sm:$0xff]  ;;  %v2957_v19 = vpack.c.bf16 %v448_v12, %v444_v11  ;;  %v450_v20 = vld [vmem:[#allocation10 + $0x108] sm:$0xff] }
  0x58   :  { %1996 = vmatpush1.bf16.msra.mxu0 %v1995_v36  ;;  %v445_v15 = vld [vmem:[#allocation10 + $0xe0] sm:$0xff]  ;;  %v447_v18 = vld [vmem:[#allocation10 + $0xf0] sm:$0xff]  ;;  %v454_v21 = vld [vmem:[#allocation10 + $0x128] sm:$0xff] }
  0x59   :  { %2028 = vmatpush1.bf16.msra.mxu1 %v2027_v37  ;;  %2030 = vmatprep.subr.bf16.mxu0 %v2917_v38  ;;  %v68_v22 = vld [vmem:[#allocation5 + $0x18] sm:$0xff]  ;;  %v2960_v23 = vpack.c.bf16 %v445_v15, %v441_v14  ;;  %v2964_v26 = vpack.c.bf16 %v447_v18, %v443_v17  ;;  %v449_v27 = vld [vmem:[#allocation10 + $0x100] sm:$0xff]  ;;  %v2968_v29 = vpack.c.bf16 %v454_v21, %v450_v20  ;;  %v451_v30 = vld [vmem:[#allocation10 + $0x110] sm:$0xff] }
  0x5a   :  { %2062 = vmatprep.subr.bf16.mxu1 %v2919_v41  ;;  %v452_v24 = vld [vmem:[#allocation10 + $0x118] sm:$0xff]  ;;  %v453_v28 = vld [vmem:[#allocation10 + $0x120] sm:$0xff]  ;;  %v455_v31 = vld [vmem:[#allocation10 + $0x130] sm:$0xff] }
  0x5b   :  { %224 = vmatmul.mubr.f32.vlgmr.msra.gmra.mrb[0].mxu0 %v65_v46  ;;  %v456_v25 = vld [vmem:[#allocation10 + $0x138] sm:$0xff]  ;;  %v458_v33 = vld [vmem:[#allocation10 + $0x148] sm:$0xff]  ;;  %v69_v35 = vld [vmem:[#allocation5 + $0x20] sm:$0xff]  ;;  %v2974_v36 = vpack.c.bf16 %v453_v28, %v449_v27  ;;  %v2978_v40 = vpack.c.bf16 %v455_v31, %v451_v30  ;;  %v139_v28 = vlaneseq }
  0x5c   :  { %337 = vmatmul.mubr.f32.vlgmr.msra.gmra.mrb[0].mxu1 %v65_v46  ;;  %2032 = vmatpush1.bf16.msra.mxu0 %v2921_v47  ;;  %v2971_v32 = vpack.c.bf16 %v456_v25, %v452_v24  ;;  %v462_v34 = vld [vmem:[#allocation10 + $0x168] sm:$0xff]  ;;  %v460_v37 = vld [vmem:[#allocation10 + $0x158] sm:$0xff]  ;;  %v457_v42 = vld [vmem:[#allocation10 + $0x140] sm:$0xff] }
  0x5d   :  { %2064 = vmatpush1.bf16.msra.mxu1 %v2924_v50  ;;  %229 = vmatprep.mubr.f32.mxu0 %v2843_v0  ;;  %v464_v39 = vld [vmem:[#allocation10 + $0x178] sm:$0xff]  ;;  %v461_v43 = vld [vmem:[#allocation10 + $0x160] sm:$0xff]  ;;  %v2982_v44 = vpack.c.bf16 %v462_v34, %v458_v33  ;;  %v459_v45 = vld [vmem:[#allocation10 + $0x150] sm:$0xff]  ;;  %v140_v30 = vshrl.u32 %v139_v28, 7 }
  0x5e   :  { %342 = vmatprep.mubr.f32.mxu1 %v2843_v0  ;;  %2034 = vmatprep.subr.bf16.mxu0 %v2927_v53  ;;  %v463_v46 = vld [vmem:[#allocation10 + $0x170] sm:$0xff]  ;;  %v2985_v48 = vpack.c.bf16 %v464_v39, %v460_v37  ;;  %v466_v49 = vld [vmem:[#allocation10 + $0x188] sm:$0xff]  ;;  %v2988_v54 = vpack.c.bf16 %v461_v43, %v457_v42  ;;  %v468_v55 = vld [vmem:[#allocation10 + $0x198] sm:$0xff] }
  0x5f   :  { %230 = vmatmul.mubr.f32.gmra.mrb[2].mxu0 %v66_v59  ;;  %2066 = vmatprep.subr.bf16.mxu1 %v2929_v56  ;;  %v470_v51 = vld [vmem:[#allocation10 + $0x1a8] sm:$0xff]  ;;  %v472_v57 = vld [vmem:[#allocation10 + $0x1b8] sm:$0xff]  ;;  %v2992_v58 = vpack.c.bf16 %v463_v46, %v459_v45  ;;  %v469_v61 = vld [vmem:[#allocation10 + $0x1a0] sm:$0xff]  ;;  %v141_v31 = vsub.s32 0, %v140_v30  ;;  %v145_v34 = vsub.s32 1, %v140_v30  ;;  %v153_v42 = vsub.s32 3, %v140_v30 }
  0x60   :  { %343 = vmatmul.mubr.f32.gmra.mrb[2].mxu1 %v66_v59  ;;  %2036 = vmatpush1.bf16.msra.mxu0 %v2932_v60  ;;  %v70_v52 = vld [vmem:[#allocation5 + $0x28] sm:$0xff]  ;;  %v465_v59 = vld [vmem:[#allocation10 + $0x180] sm:$0xff]  ;;  %v2996_v62 = vpack.c.bf16 %v470_v51, %v466_v49  ;;  %v467_v1 = vld [vmem:[#allocation10 + $0x190] sm:$0xff]  ;;  %v2999_v4 = vpack.c.bf16 %v472_v57, %v468_v55 }
  0x61   :  { %2068 = vmatpush1.bf16.msra.mxu1 %v2936_v63  ;;  %235 = vmatprep.mubr.f32.mxu0 %v2843_v0  ;;  %v471_v2 = vld [vmem:[#allocation10 + $0x1b0] sm:$0xff]  ;;  %v474_v5 = vld [vmem:[#allocation10 + $0x1c8] sm:$0xff]  ;;  %v476_v11 = vld [vmem:[#allocation10 + $0x1d8] sm:$0xff] }
  0x62   :  { %348 = vmatprep.mubr.f32.mxu1 %v2843_v0  ;;  %2038 = vmatprep.subr.bf16.mxu0 %v2940_v3  ;;  %v478_v7 = vld [vmem:[#allocation10 + $0x1e8] sm:$0xff]  ;;  %v71_v8 = vld [vmem:[#allocation5 + $0x30] sm:$0xff]  ;;  %v480_v12 = vld [vmem:[#allocation10 + $0x1f8] sm:$0xff]  ;;  %v3006_v14 = vpack.c.bf16 %v471_v2, %v467_v1 }
  0x63   :  { %236 = vmatmul.mubr.f32.gmra.mrb[4].mxu0 %v67_v9  ;;  %2070 = vmatprep.subr.bf16.mxu1 %v2943_v6  ;;  %v473_v15 = vld [vmem:[#allocation10 + $0x1c0] sm:$0xff]  ;;  %v3010_v18 = vpack.c.bf16 %v478_v7, %v474_v5  ;;  %v475_v20 = vld [vmem:[#allocation10 + $0x1d0] sm:$0xff]  ;;  %v72_v24 = vld [vmem:[#allocation5 + $0x38] sm:$0xff] }
  0x64   :  { %349 = vmatmul.mubr.f32.gmra.mrb[4].mxu1 %v67_v9  ;;  %2040 = vmatpush1.bf16.msra.mxu0 %v2946_v10  ;;  %v3002_v9 = vpack.c.bf16 %v469_v61, %v465_v59  ;;  %v477_v17 = vld [vmem:[#allocation10 + $0x1e0] sm:$0xff]  ;;  %v479_v21 = vld [vmem:[#allocation10 + $0x1f0] sm:$0xff]  ;;  %v149_v59 = vsub.s32 2, %v140_v30 }
  0x65   :  { %2072 = vmatpush1.bf16.msra.mxu1 %v2950_v13  ;;  %241 = vmatprep.mubr.f32.mxu0 %v2843_v0  ;;  %v3016_v25 = vpack.c.bf16 %v477_v17, %v473_v15  ;;  %v3020_v27 = vpack.c.bf16 %v479_v21, %v475_v20  ;;  %v137_v33 = vld [vmem:[%s3354_s3] sm:$0xf]  ;;  %s2844_s3 = smov [#allocation11]  }
  0x66   :  { %354 = vmatprep.mubr.f32.mxu1 %v2843_v0  ;;  %2042 = vmatprep.subr.bf16.mxu0 %v2954_v16  ;;  %v3072_v37 = vrot.slane %v137_v33, %v145_v34  ;;  %v3076_v57 = vrot.slane %v137_v33, %v153_v42  ;;  %v3079_v1 = vrot.slane %v137_v33, %v149_v59  ;;  %s1921_s26 = sshll.u32 %s2844_s3, 4  ;;  %s1922_s26 = int_to_ptr.vmem [resolvable:$true] %s1921_s26 }
  0x67   :  { %242 = vmatmul.mubr.f32.gmra.mrb[6].mxu0 %v68_v22  ;;  %2074 = vmatprep.subr.bf16.mxu1 %v2957_v19  ;;  %s2808_s29 = scalar_lea.vmem %s1922_s26, 1024  ;;  %p2813_p11 = scmp.lt.s32.totalorder %s1922_s26, %s1922_s26 }
  0x68   :  { %355 = vmatmul.mubr.f32.gmra.mrb[6].mxu1 %v68_v22  ;;  %2044 = vmatpush1.bf16.msra.mxu0 %v2960_v23  ;;  %v3013_v22 = vpack.c.bf16 %v480_v12, %v476_v11  ;;  %p2809_p10 = scmp.ne.s32.totalorder %s1922_s26, %s2808_s29  ;;  %p2814_p12 = scmp.lt.s32.totalorder %s2808_s29, %s2808_s29 }
  0x69   :  { %2076 = vmatpush1.bf16.msra.mxu1 %v2964_v26  ;;  %247 = vmatprep.mubr.f32.mxu0 %v2843_v0 }
  0x6a   :  { %360 = vmatprep.mubr.f32.mxu1 %v2843_v0  ;;  %2046 = vmatprep.subr.bf16.mxu0 %v2968_v29  ;;  %p2815_p13 = por %p2814_p12, %p2813_p11 }
  0x6b   :  { %248 = vmatmul.mubr.f32.gmra.mrb[8].mxu0 %v69_v35  ;;  %2078 = vmatprep.subr.bf16.mxu1 %v2971_v32 }
  0x6c   :  { %361 = vmatmul.mubr.f32.gmra.mrb[8].mxu1 %v69_v35  ;;  %2048 = vmatpush1.bf16.msra.mxu0 %v2974_v36  ;;  %v3070_v35 = vrot.slane %v137_v33, %v141_v31  ;;  %p2816_p0 = pnand %p2815_p13, %p2809_p10 }
  0x6d   :  { %2080 = vmatpush1.bf16.msra.mxu1 %v2978_v40  ;;  %253 = vmatprep.mubr.f32.mxu0 %v2843_v0 }
  0x6e   :  { %366 = vmatprep.mubr.f32.mxu1 %v2843_v0  ;;  %2050 = vmatprep.subr.bf16.mxu0 %v2982_v44 }
  0x6f   :  { %254 = vmatmul.mubr.f32.gmra.mrb[10].mxu0 %v70_v52  ;;  %2082 = vmatprep.subr.bf16.mxu1 %v2985_v48 }
  0x70   :  { %367 = vmatmul.mubr.f32.gmra.mrb[10].mxu1 %v70_v52  ;;  %2052 = vmatpush1.bf16.msra.mxu0 %v2988_v54 }
  0x71   :  { %2084 = vmatpush1.bf16.msra.mxu1 %v2992_v58  ;;  %259 = vmatprep.mubr.f32.mxu0 %v2843_v0 }
  0x72   :  { %372 = vmatprep.mubr.f32.mxu1 %v2843_v0  ;;  %2054 = vmatprep.subr.bf16.mxu0 %v2996_v62 }
  0x73   :  { %260 = vmatmul.mubr.f32.gmra.mrb[12].mxu0 %v71_v8  ;;  %2086 = vmatprep.subr.bf16.mxu1 %v2999_v4 }
  0x74   :  { %373 = vmatmul.mubr.f32.gmra.mrb[12].mxu1 %v71_v8  ;;  %2056 = vmatpush1.bf16.msra.mxu0 %v3002_v9 }
  0x75   :  { %2088 = vmatpush1.bf16.msra.mxu1 %v3006_v14  ;;  %265 = vmatprep.mubr.f32.mxu0 %v2843_v0 }
  0x76   :  { %378 = vmatprep.mubr.f32.mxu1 %v2843_v0  ;;  %2058 = vmatprep.subr.bf16.mxu0 %v3010_v18 }
  0x77   :  { %266 = vmatmul.mubr.f32.gmra.mrb[14].mxu0 %v72_v24  ;;  %2090 = vmatprep.subr.bf16.mxu1 %v3013_v22 }
  0x78   :  { %379 = vmatmul.mubr.f32.gmra.mrb[14].mxu1 %v72_v24  ;;  %2060 = vmatpush1.bf16.msra.mxu0 %v3016_v25 }
  0x79   :  { %2092 = vmatpush1.bf16.msra.mxu1 %v3020_v27  ;;  %554 = vmatprep.mubr.f32.mxu0 %v2843_v0 }
  0x7a   :  { %625 = vmatprep.mubr.f32.mxu1 %v2843_v0  ;;  %2094 = vmatprep.subr.bf16.mxu0 %v2917_v38 }
  0x7b   :  { %555 = vmatmul.mubr.f32.vlgmr.msra.gmra.mrb[0].mxu0 %v2843_v0  ;;  %2126 = vmatprep.subr.bf16.mxu1 %v2919_v41 }
  0x7c   :  { %626 = vmatmul.mubr.f32.vlgmr.msra.gmra.mrb[0].mxu1 %v2843_v0  ;;  %2096 = vmatpush1.bf16.msra.mxu0 %v2921_v47 }
  0x7d   :  { %2128 = vmatpush1.bf16.msra.mxu1 %v2924_v50  ;;  %2098 = vmatprep.subr.bf16.mxu0 %v2927_v53 }
  0x7e   :  { %2130 = vmatprep.subr.bf16.mxu1 %v2929_v56  ;;  %732 = vmatprep.mubr.f32.mxu0 %v2843_v0 }
  0x7f   :  { %803 = vmatprep.mubr.f32.mxu1 %v2843_v0 }
  0x80   :  { %2100 = vmatpush1.bf16.msra.mxu0 %v2932_v60 }
  0x81   :  { %2132 = vmatpush1.bf16.msra.mxu1 %v2936_v63  ;;  %2102 = vmatprep.subr.bf16.mxu0 %v2940_v3 }
  0x82   :  { %2134 = vmatprep.subr.bf16.mxu1 %v2943_v6 }
  0x84   :  { %2104 = vmatpush1.bf16.msra.mxu0 %v2946_v10 }
  0x85   :  { %2136 = vmatpush1.bf16.msra.mxu1 %v2950_v13  ;;  %2106 = vmatprep.subr.bf16.mxu0 %v2954_v16 }
  0x86   :  { %2138 = vmatprep.subr.bf16.mxu1 %v2957_v19 }
  0x88   :  { %2108 = vmatpush1.bf16.msra.mxu0 %v2960_v23 }
  0x89   :  { %2140 = vmatpush1.bf16.msra.mxu1 %v2964_v26  ;;  %2110 = vmatprep.subr.bf16.mxu0 %v2968_v29 }
  0x8a   :  { %2142 = vmatprep.subr.bf16.mxu1 %v2971_v32 }
  0x8c   :  { %2112 = vmatpush1.bf16.msra.mxu0 %v2974_v36 }
  0x8d   :  { %2144 = vmatpush1.bf16.msra.mxu1 %v2978_v40  ;;  %2114 = vmatprep.subr.bf16.mxu0 %v2982_v44 }
  0x8e   :  { %2146 = vmatprep.subr.bf16.mxu1 %v2985_v48 }
  0x90   :  { %2116 = vmatpush1.bf16.msra.mxu0 %v2988_v54 }
  0x91   :  { %2148 = vmatpush1.bf16.msra.mxu1 %v2992_v58  ;;  %2118 = vmatprep.subr.bf16.mxu0 %v2996_v62 }
  0x92   :  { %2150 = vmatprep.subr.bf16.mxu1 %v2999_v4 }
  0x94   :  { %2120 = vmatpush1.bf16.msra.mxu0 %v3002_v9 }
  0x95   :  { %2152 = vmatpush1.bf16.msra.mxu1 %v3006_v14  ;;  %2122 = vmatprep.subr.bf16.mxu0 %v3010_v18 }
  0x96   :  { %2154 = vmatprep.subr.bf16.mxu1 %v3013_v22 }
  0x98   :  { %2124 = vmatpush1.bf16.msra.mxu0 %v3016_v25 }
  0x99   :  { %2156 = vmatpush1.bf16.msra.mxu1 %v3020_v27  ;;  %2158 = vmatprep.subr.bf16.mxu0 %v2917_v38 }
  0x9a   :  { %2190 = vmatprep.subr.bf16.mxu1 %v2919_v41 }
 0x14e   :  { %v556_v39 = vpop.f32.mrb[0].mxu0 }
 0x14f   :  { %v2541_v43 = vadd.f32 %v556_v39, %v3070_v35  ;;  %v627_v45 = vpop.f32.mrb[0].mxu1  ;;  %v558_v46 = vpop.f32.mrb[1].mxu0 }
 0x150   :  { %v2542_v49 = vadd.f32 %v558_v46, %v3072_v37  ;;  %v629_v51 = vpop.f32.mrb[1].mxu1  ;;  %v2557_v5 = vadd.f32 %v627_v45, %v3079_v1 }
 0x151   :  { %v1941_v52 = vmul.f32 -1.442695, %v2541_v43  ;;  %v2558_v61 = vadd.f32 %v629_v51, %v3076_v57 }
 0x152   :  { %v1942_v55 = vmul.f32 -1.442695, %v2542_v49 }
 0x153   :  { %2614 = vpow2.f32 %v1941_v52  ;;  %v1943_v2 = vmul.f32 -1.442695, %v2558_v61 }
 0x154   :  { %2616 = vpow2.f32 %v1942_v55 }
 0x155   :  { %2618 = vpow2.f32 %v1943_v2 }
 0x156   :  { %2620 = vtanh.f32 %v2557_v5 }
 0x15d   :  { %v2615_v7 = vpop.eup %2614 }
 0x15e   :  { %v2617_v8 = vpop.eup %2616  ;;  %v639_v11 = vadd.f32 1.0, %v2615_v7 }
 0x15f   :  { %v645_v12 = vadd.f32 1.0, %v2617_v8  ;;  %v2619_v15 = vpop.eup %2618 }
 0x160   :  { %2622 = vrcp.f32 %v639_v11  ;;  %v2621_v17 = vpop.eup %2620  ;;  %v652_v28 = vadd.f32 1.0, %v2619_v15 }
 0x161   :  { %2624 = vrcp.f32 %v645_v12 }
 0x162   :  { %2626 = vrcp.f32 %v652_v28 }
 0x16a   :  { %v2623_v20 = vpop.eup %2622 }
 0x16b   :  { %v2625_v21 = vpop.eup %2624  ;;  %v656_v24 = vmul.f32 %v2623_v20, %v2621_v17 }
 0x16c   :  { %v655_v30 = vmul.f32 0.0, %v2625_v21  ;;  %v2627_v33 = vpop.eup %2626 }
 0x16e   :  { %v3082_v31 = vadd.f32 %v656_v24, %v655_v30 }
 0x170   :  { %2628 = vtanh.f32 %v3082_v31 }
 0x17a   :  { %v2629_v34 = vpop.eup %2628 }
 0x17b   :  { %v659_v39 = vmul.f32 %v2629_v34, %v2627_v33 }
 0x17d   :  { %660 = vst [vmem:[#allocation11] sm:$0xff] %v659_v39  ;;  %733 = vmatmul.mubr.f32.vlgmr.msra.gmra.mrb[2].mxu0 %v659_v39  ;;  %804 = vmatmul.mubr.f32.vlgmr.msra.gmra.mrb[2].mxu1 %v659_v39 }
 0x17e   :  { %2160 = vmatpush1.bf16.msra.mxu0 %v2921_v47  ;;  %2192 = vmatpush1.bf16.msra.mxu1 %v2924_v50 }
 0x17f   :  { %2162 = vmatprep.subr.bf16.mxu0 %v2927_v53  ;;  %2194 = vmatprep.subr.bf16.mxu1 %v2929_v56 }
 0x180   :  { %911 = vmatprep.mubr.f32.mxu0 %v2843_v0  ;;  %982 = vmatprep.mubr.f32.mxu1 %v2843_v0 }
 0x182   :  { %2164 = vmatpush1.bf16.msra.mxu0 %v2932_v60  ;;  %2196 = vmatpush1.bf16.msra.mxu1 %v2936_v63 }
 0x183   :  { %2166 = vmatprep.subr.bf16.mxu0 %v2940_v3  ;;  %2198 = vmatprep.subr.bf16.mxu1 %v2943_v6 }
 0x186   :  { %2168 = vmatpush1.bf16.msra.mxu0 %v2946_v10  ;;  %2200 = vmatpush1.bf16.msra.mxu1 %v2950_v13 }
 0x187   :  { %2170 = vmatprep.subr.bf16.mxu0 %v2954_v16  ;;  %2202 = vmatprep.subr.bf16.mxu1 %v2957_v19 }
 0x18a   :  { %2172 = vmatpush1.bf16.msra.mxu0 %v2960_v23  ;;  %2204 = vmatpush1.bf16.msra.mxu1 %v2964_v26 }
 0x18b   :  { %2174 = vmatprep.subr.bf16.mxu0 %v2968_v29  ;;  %2206 = vmatprep.subr.bf16.mxu1 %v2971_v32 }
 0x18e   :  { %2176 = vmatpush1.bf16.msra.mxu0 %v2974_v36  ;;  %2208 = vmatpush1.bf16.msra.mxu1 %v2978_v40 }
 0x18f   :  { %2178 = vmatprep.subr.bf16.mxu0 %v2982_v44  ;;  %2210 = vmatprep.subr.bf16.mxu1 %v2985_v48 }
 0x192   :  { %2180 = vmatpush1.bf16.msra.mxu0 %v2988_v54  ;;  %2212 = vmatpush1.bf16.msra.mxu1 %v2992_v58 }
 0x193   :  { %2182 = vmatprep.subr.bf16.mxu0 %v2996_v62  ;;  %2214 = vmatprep.subr.bf16.mxu1 %v2999_v4 }
 0x196   :  { %2184 = vmatpush1.bf16.msra.mxu0 %v3002_v9  ;;  %2216 = vmatpush1.bf16.msra.mxu1 %v3006_v14 }
 0x197   :  { %2186 = vmatprep.subr.bf16.mxu0 %v3010_v18  ;;  %2218 = vmatprep.subr.bf16.mxu1 %v3013_v22 }
 0x19a   :  { %2188 = vmatpush1.bf16.msra.mxu0 %v3016_v25  ;;  %2220 = vmatpush1.bf16.msra.mxu1 %v3020_v27 }
 0x19b   :  { %2222 = vmatprep.subr.bf16.mxu0 %v2917_v38  ;;  %2254 = vmatprep.subr.bf16.mxu1 %v2919_v41 }
 0x250   :  { %v734_v42 = vpop.f32.mrb[2].mxu0  ;;  %v805_v43 = vpop.f32.mrb[2].mxu1 }
 0x251   :  { %v2543_v45 = vadd.f32 %v734_v42, %v3070_v35  ;;  %v736_v46 = vpop.f32.mrb[3].mxu0  ;;  %v807_v49 = vpop.f32.mrb[3].mxu1  ;;  %v2559_v2 = vadd.f32 %v805_v43, %v3079_v1 }
 0x252   :  { %v2544_v51 = vadd.f32 %v736_v46, %v3072_v37  ;;  %v2560_v59 = vadd.f32 %v807_v49, %v3076_v57 }
 0x253   :  { %v1944_v52 = vmul.f32 -1.442695, %v2543_v45 }
 0x254   :  { %v1945_v55 = vmul.f32 -1.442695, %v2544_v51  ;;  %v1946_v61 = vmul.f32 -1.442695, %v2560_v59 }
 0x255   :  { %2630 = vpow2.f32 %v1944_v52 }
 0x256   :  { %2632 = vpow2.f32 %v1945_v55 }
 0x257   :  { %2634 = vpow2.f32 %v1946_v61 }
 0x258   :  { %2636 = vtanh.f32 %v2559_v2 }
 0x25f   :  { %v2631_v5 = vpop.eup %2630 }
 0x260   :  { %v2633_v7 = vpop.eup %2632  ;;  %v817_v8 = vadd.f32 1.0, %v2631_v5 }
 0x261   :  { %v823_v11 = vadd.f32 1.0, %v2633_v7  ;;  %v2635_v12 = vpop.eup %2634 }
 0x262   :  { %2638 = vrcp.f32 %v817_v8  ;;  %v2637_v15 = vpop.eup %2636  ;;  %v830_v24 = vadd.f32 1.0, %v2635_v12 }
 0x263   :  { %2640 = vrcp.f32 %v823_v11 }
 0x264   :  { %2642 = vrcp.f32 %v830_v24 }
 0x26c   :  { %v2639_v17 = vpop.eup %2638 }
 0x26d   :  { %v2641_v20 = vpop.eup %2640  ;;  %v834_v21 = vmul.f32 %v2639_v17, %v2637_v15 }
 0x26e   :  { %v833_v28 = vmul.f32 %v2641_v20, %v3082_v31  ;;  %v2643_v33 = vpop.eup %2642 }
 0x270   :  { %v3124_v30 = vadd.f32 %v834_v21, %v833_v28 }
 0x272   :  { %2644 = vtanh.f32 %v3124_v30 }
 0x27c   :  { %v2645_v34 = vpop.eup %2644 }
 0x27d   :  { %v837_v39 = vmul.f32 %v2645_v34, %v2643_v33 }
 0x27f   :  { %839 = vst [vmem:[#allocation11 + $0x8] sm:$0xff] %v837_v39  ;;  %912 = vmatmul.mubr.f32.vlgmr.msra.gmra.mrb[4].mxu0 %v837_v39  ;;  %983 = vmatmul.mubr.f32.vlgmr.msra.gmra.mrb[4].mxu1 %v837_v39 }
 0x280   :  { %2224 = vmatpush1.bf16.msra.mxu0 %v2921_v47  ;;  %2256 = vmatpush1.bf16.msra.mxu1 %v2924_v50 }
 0x281   :  { %2226 = vmatprep.subr.bf16.mxu0 %v2927_v53  ;;  %2258 = vmatprep.subr.bf16.mxu1 %v2929_v56 }
 0x282   :  { %1090 = vmatprep.mubr.f32.mxu0 %v2843_v0  ;;  %1161 = vmatprep.mubr.f32.mxu1 %v2843_v0 }
 0x284   :  { %2228 = vmatpush1.bf16.msra.mxu0 %v2932_v60  ;;  %2260 = vmatpush1.bf16.msra.mxu1 %v2936_v63 }
 0x285   :  { %2230 = vmatprep.subr.bf16.mxu0 %v2940_v3  ;;  %2262 = vmatprep.subr.bf16.mxu1 %v2943_v6 }
 0x288   :  { %2232 = vmatpush1.bf16.msra.mxu0 %v2946_v10  ;;  %2264 = vmatpush1.bf16.msra.mxu1 %v2950_v13 }
 0x289   :  { %2234 = vmatprep.subr.bf16.mxu0 %v2954_v16  ;;  %2266 = vmatprep.subr.bf16.mxu1 %v2957_v19 }
 0x28c   :  { %2236 = vmatpush1.bf16.msra.mxu0 %v2960_v23  ;;  %2268 = vmatpush1.bf16.msra.mxu1 %v2964_v26 }
 0x28d   :  { %2238 = vmatprep.subr.bf16.mxu0 %v2968_v29  ;;  %2270 = vmatprep.subr.bf16.mxu1 %v2971_v32 }
 0x290   :  { %2240 = vmatpush1.bf16.msra.mxu0 %v2974_v36  ;;  %2272 = vmatpush1.bf16.msra.mxu1 %v2978_v40 }
 0x291   :  { %2242 = vmatprep.subr.bf16.mxu0 %v2982_v44  ;;  %2274 = vmatprep.subr.bf16.mxu1 %v2985_v48 }
 0x294   :  { %2244 = vmatpush1.bf16.msra.mxu0 %v2988_v54  ;;  %2276 = vmatpush1.bf16.msra.mxu1 %v2992_v58 }
 0x295   :  { %2246 = vmatprep.subr.bf16.mxu0 %v2996_v62  ;;  %2278 = vmatprep.subr.bf16.mxu1 %v2999_v4 }
 0x298   :  { %2248 = vmatpush1.bf16.msra.mxu0 %v3002_v9  ;;  %2280 = vmatpush1.bf16.msra.mxu1 %v3006_v14 }
 0x299   :  { %2250 = vmatprep.subr.bf16.mxu0 %v3010_v18  ;;  %2282 = vmatprep.subr.bf16.mxu1 %v3013_v22 }
 0x29c   :  { %2252 = vmatpush1.bf16.msra.mxu0 %v3016_v25  ;;  %2284 = vmatpush1.bf16.msra.mxu1 %v3020_v27 }
 0x29d   :  { %2286 = vmatprep.subr.bf16.mxu0 %v2917_v38  ;;  %2318 = vmatprep.subr.bf16.mxu1 %v2919_v41 }
 0x352   :  { %v913_v31 = vpop.f32.mrb[4].mxu0  ;;  %v984_v42 = vpop.f32.mrb[4].mxu1 }
 0x353   :  { %v2545_v43 = vadd.f32 %v913_v31, %v3070_v35  ;;  %v915_v45 = vpop.f32.mrb[5].mxu0  ;;  %v986_v46 = vpop.f32.mrb[5].mxu1  ;;  %v2561_v61 = vadd.f32 %v984_v42, %v3079_v1 }
 0x354   :  { %v2546_v49 = vadd.f32 %v915_v45, %v3072_v37  ;;  %v2562_v55 = vadd.f32 %v986_v46, %v3076_v57 }
 0x355   :  { %v1947_v51 = vmul.f32 -1.442695, %v2545_v43 }
 0x356   :  { %v1948_v52 = vmul.f32 -1.442695, %v2546_v49  ;;  %v1949_v59 = vmul.f32 -1.442695, %v2562_v55 }
 0x357   :  { %2646 = vpow2.f32 %v1947_v51 }
 0x358   :  { %2648 = vpow2.f32 %v1948_v52 }
 0x359   :  { %2650 = vpow2.f32 %v1949_v59 }
 0x35a   :  { %2652 = vtanh.f32 %v2561_v61 }
 0x361   :  { %v2647_v2 = vpop.eup %2646 }
 0x362   :  { %v2649_v5 = vpop.eup %2648  ;;  %v996_v7 = vadd.f32 1.0, %v2647_v2 }
 0x363   :  { %v1002_v8 = vadd.f32 1.0, %v2649_v5  ;;  %v2651_v11 = vpop.eup %2650 }
 0x364   :  { %2654 = vrcp.f32 %v996_v7  ;;  %v2653_v12 = vpop.eup %2652  ;;  %v1009_v21 = vadd.f32 1.0, %v2651_v11 }
 0x365   :  { %2656 = vrcp.f32 %v1002_v8 }
 0x366   :  { %2658 = vrcp.f32 %v1009_v21 }
 0x36e   :  { %v2655_v15 = vpop.eup %2654 }
 0x36f   :  { %v2657_v17 = vpop.eup %2656  ;;  %v1013_v20 = vmul.f32 %v2655_v15, %v2653_v12 }
 0x370   :  { %v1012_v24 = vmul.f32 %v2657_v17, %v3124_v30  ;;  %v2659_v33 = vpop.eup %2658 }
 0x372   :  { %v3166_v28 = vadd.f32 %v1013_v20, %v1012_v24 }
 0x374   :  { %2660 = vtanh.f32 %v3166_v28 }
 0x37e   :  { %v2661_v34 = vpop.eup %2660 }
 0x37f   :  { %v1016_v39 = vmul.f32 %v2661_v34, %v2659_v33 }
 0x381   :  { %1018 = vst [vmem:[#allocation11 + $0x10] sm:$0xff] %v1016_v39  ;;  %1091 = vmatmul.mubr.f32.vlgmr.msra.gmra.mrb[6].mxu0 %v1016_v39  ;;  %1162 = vmatmul.mubr.f32.vlgmr.msra.gmra.mrb[6].mxu1 %v1016_v39 }
 0x382   :  { %2288 = vmatpush1.bf16.msra.mxu0 %v2921_v47  ;;  %2320 = vmatpush1.bf16.msra.mxu1 %v2924_v50 }
 0x383   :  { %2290 = vmatprep.subr.bf16.mxu0 %v2927_v53  ;;  %2322 = vmatprep.subr.bf16.mxu1 %v2929_v56 }
 0x384   :  { %1269 = vmatprep.mubr.f32.mxu0 %v2843_v0  ;;  %1340 = vmatprep.mubr.f32.mxu1 %v2843_v0 }
 0x386   :  { %2292 = vmatpush1.bf16.msra.mxu0 %v2932_v60  ;;  %2324 = vmatpush1.bf16.msra.mxu1 %v2936_v63 }
 0x387   :  { %2294 = vmatprep.subr.bf16.mxu0 %v2940_v3  ;;  %2326 = vmatprep.subr.bf16.mxu1 %v2943_v6 }
 0x38a   :  { %2296 = vmatpush1.bf16.msra.mxu0 %v2946_v10  ;;  %2328 = vmatpush1.bf16.msra.mxu1 %v2950_v13 }
 0x38b   :  { %2298 = vmatprep.subr.bf16.mxu0 %v2954_v16  ;;  %2330 = vmatprep.subr.bf16.mxu1 %v2957_v19 }
 0x38e   :  { %2300 = vmatpush1.bf16.msra.mxu0 %v2960_v23  ;;  %2332 = vmatpush1.bf16.msra.mxu1 %v2964_v26 }
 0x38f   :  { %2302 = vmatprep.subr.bf16.mxu0 %v2968_v29  ;;  %2334 = vmatprep.subr.bf16.mxu1 %v2971_v32 }
 0x392   :  { %2304 = vmatpush1.bf16.msra.mxu0 %v2974_v36  ;;  %2336 = vmatpush1.bf16.msra.mxu1 %v2978_v40 }
 0x393   :  { %2306 = vmatprep.subr.bf16.mxu0 %v2982_v44  ;;  %2338 = vmatprep.subr.bf16.mxu1 %v2985_v48 }
 0x396   :  { %2308 = vmatpush1.bf16.msra.mxu0 %v2988_v54  ;;  %2340 = vmatpush1.bf16.msra.mxu1 %v2992_v58 }
 0x397   :  { %2310 = vmatprep.subr.bf16.mxu0 %v2996_v62  ;;  %2342 = vmatprep.subr.bf16.mxu1 %v2999_v4 }
 0x39a   :  { %2312 = vmatpush1.bf16.msra.mxu0 %v3002_v9  ;;  %2344 = vmatpush1.bf16.msra.mxu1 %v3006_v14 }
 0x39b   :  { %2314 = vmatprep.subr.bf16.mxu0 %v3010_v18  ;;  %2346 = vmatprep.subr.bf16.mxu1 %v3013_v22 }
 0x39e   :  { %2316 = vmatpush1.bf16.msra.mxu0 %v3016_v25  ;;  %2348 = vmatpush1.bf16.msra.mxu1 %v3020_v27 }
 0x39f   :  { %2350 = vmatprep.subr.bf16.mxu0 %v2917_v38  ;;  %2382 = vmatprep.subr.bf16.mxu1 %v2919_v41 }
 0x454   :  { %v1092_v30 = vpop.f32.mrb[6].mxu0  ;;  %v1163_v31 = vpop.f32.mrb[6].mxu1 }
 0x455   :  { %v2547_v42 = vadd.f32 %v1092_v30, %v3070_v35  ;;  %v1094_v43 = vpop.f32.mrb[7].mxu0  ;;  %v1165_v45 = vpop.f32.mrb[7].mxu1  ;;  %v2563_v59 = vadd.f32 %v1163_v31, %v3079_v1 }
 0x456   :  { %v2548_v46 = vadd.f32 %v1094_v43, %v3072_v37  ;;  %v2564_v52 = vadd.f32 %v1165_v45, %v3076_v57 }
 0x457   :  { %v1950_v49 = vmul.f32 -1.442695, %v2547_v42 }
 0x458   :  { %v1951_v51 = vmul.f32 -1.442695, %v2548_v46  ;;  %v1952_v55 = vmul.f32 -1.442695, %v2564_v52 }
 0x459   :  { %2662 = vpow2.f32 %v1950_v49 }
 0x45a   :  { %2664 = vpow2.f32 %v1951_v51 }
 0x45b   :  { %2666 = vpow2.f32 %v1952_v55 }
 0x45c   :  { %2668 = vtanh.f32 %v2563_v59 }
 0x463   :  { %v2663_v61 = vpop.eup %2662 }
 0x464   :  { %v2665_v2 = vpop.eup %2664  ;;  %v1175_v5 = vadd.f32 1.0, %v2663_v61 }
 0x465   :  { %v1181_v7 = vadd.f32 1.0, %v2665_v2  ;;  %v2667_v8 = vpop.eup %2666 }
 0x466   :  { %2670 = vrcp.f32 %v1175_v5  ;;  %v2669_v11 = vpop.eup %2668  ;;  %v1188_v20 = vadd.f32 1.0, %v2667_v8 }
 0x467   :  { %2672 = vrcp.f32 %v1181_v7 }
 0x468   :  { %2674 = vrcp.f32 %v1188_v20 }
 0x470   :  { %v2671_v12 = vpop.eup %2670 }
 0x471   :  { %v2673_v15 = vpop.eup %2672  ;;  %v1192_v17 = vmul.f32 %v2671_v12, %v2669_v11 }
 0x472   :  { %v1191_v21 = vmul.f32 %v2673_v15, %v3166_v28  ;;  %v2675_v33 = vpop.eup %2674 }
 0x474   :  { %v3208_v24 = vadd.f32 %v1192_v17, %v1191_v21 }
 0x476   :  { %2676 = vtanh.f32 %v3208_v24 }
 0x480   :  { %v2677_v34 = vpop.eup %2676 }
 0x481   :  { %v1195_v39 = vmul.f32 %v2677_v34, %v2675_v33 }
 0x483   :  { %1197 = vst [vmem:[#allocation11 + $0x18] sm:$0xff] %v1195_v39  ;;  %1270 = vmatmul.mubr.f32.vlgmr.msra.gmra.mrb[8].mxu0 %v1195_v39  ;;  %1341 = vmatmul.mubr.f32.vlgmr.msra.gmra.mrb[8].mxu1 %v1195_v39 }
 0x484   :  { %2352 = vmatpush1.bf16.msra.mxu0 %v2921_v47  ;;  %2384 = vmatpush1.bf16.msra.mxu1 %v2924_v50 }
 0x485   :  { %2354 = vmatprep.subr.bf16.mxu0 %v2927_v53  ;;  %2386 = vmatprep.subr.bf16.mxu1 %v2929_v56 }
 0x486   :  { %1448 = vmatprep.mubr.f32.mxu0 %v2843_v0  ;;  %1519 = vmatprep.mubr.f32.mxu1 %v2843_v0 }
 0x488   :  { %2356 = vmatpush1.bf16.msra.mxu0 %v2932_v60  ;;  %2388 = vmatpush1.bf16.msra.mxu1 %v2936_v63 }
 0x489   :  { %2358 = vmatprep.subr.bf16.mxu0 %v2940_v3  ;;  %2390 = vmatprep.subr.bf16.mxu1 %v2943_v6 }
 0x48c   :  { %2360 = vmatpush1.bf16.msra.mxu0 %v2946_v10  ;;  %2392 = vmatpush1.bf16.msra.mxu1 %v2950_v13 }
 0x48d   :  { %2362 = vmatprep.subr.bf16.mxu0 %v2954_v16  ;;  %2394 = vmatprep.subr.bf16.mxu1 %v2957_v19 }
 0x490   :  { %2364 = vmatpush1.bf16.msra.mxu0 %v2960_v23  ;;  %2396 = vmatpush1.bf16.msra.mxu1 %v2964_v26 }
 0x491   :  { %2366 = vmatprep.subr.bf16.mxu0 %v2968_v29  ;;  %2398 = vmatprep.subr.bf16.mxu1 %v2971_v32 }
 0x494   :  { %2368 = vmatpush1.bf16.msra.mxu0 %v2974_v36  ;;  %2400 = vmatpush1.bf16.msra.mxu1 %v2978_v40 }
 0x495   :  { %2370 = vmatprep.subr.bf16.mxu0 %v2982_v44  ;;  %2402 = vmatprep.subr.bf16.mxu1 %v2985_v48 }
 0x498   :  { %2372 = vmatpush1.bf16.msra.mxu0 %v2988_v54  ;;  %2404 = vmatpush1.bf16.msra.mxu1 %v2992_v58 }
 0x499   :  { %2374 = vmatprep.subr.bf16.mxu0 %v2996_v62  ;;  %2406 = vmatprep.subr.bf16.mxu1 %v2999_v4 }
 0x49c   :  { %2376 = vmatpush1.bf16.msra.mxu0 %v3002_v9  ;;  %2408 = vmatpush1.bf16.msra.mxu1 %v3006_v14 }
 0x49d   :  { %2378 = vmatprep.subr.bf16.mxu0 %v3010_v18  ;;  %2410 = vmatprep.subr.bf16.mxu1 %v3013_v22 }
 0x4a0   :  { %2380 = vmatpush1.bf16.msra.mxu0 %v3016_v25  ;;  %2412 = vmatpush1.bf16.msra.mxu1 %v3020_v27 }
 0x4a1   :  { %2414 = vmatprep.subr.bf16.mxu0 %v2917_v38  ;;  %2446 = vmatprep.subr.bf16.mxu1 %v2919_v41 }
 0x556   :  { %v1271_v28 = vpop.f32.mrb[8].mxu0  ;;  %v1342_v30 = vpop.f32.mrb[8].mxu1 }
 0x557   :  { %v2549_v31 = vadd.f32 %v1271_v28, %v3070_v35  ;;  %v1273_v42 = vpop.f32.mrb[9].mxu0  ;;  %v1344_v43 = vpop.f32.mrb[9].mxu1  ;;  %v2565_v55 = vadd.f32 %v1342_v30, %v3079_v1 }
 0x558   :  { %v2550_v45 = vadd.f32 %v1273_v42, %v3072_v37  ;;  %v2566_v51 = vadd.f32 %v1344_v43, %v3076_v57 }
 0x559   :  { %v1953_v46 = vmul.f32 -1.442695, %v2549_v31 }
 0x55a   :  { %v1954_v49 = vmul.f32 -1.442695, %v2550_v45  ;;  %v1955_v52 = vmul.f32 -1.442695, %v2566_v51 }
 0x55b   :  { %2678 = vpow2.f32 %v1953_v46 }
 0x55c   :  { %2680 = vpow2.f32 %v1954_v49 }
 0x55d   :  { %2682 = vpow2.f32 %v1955_v52 }
 0x55e   :  { %2684 = vtanh.f32 %v2565_v55 }
 0x565   :  { %v2679_v59 = vpop.eup %2678 }
 0x566   :  { %v2681_v61 = vpop.eup %2680  ;;  %v1354_v2 = vadd.f32 1.0, %v2679_v59 }
 0x567   :  { %v1360_v5 = vadd.f32 1.0, %v2681_v61  ;;  %v2683_v7 = vpop.eup %2682 }
 0x568   :  { %2686 = vrcp.f32 %v1354_v2  ;;  %v2685_v8 = vpop.eup %2684  ;;  %v1367_v17 = vadd.f32 1.0, %v2683_v7 }
 0x569   :  { %2688 = vrcp.f32 %v1360_v5 }
 0x56a   :  { %2690 = vrcp.f32 %v1367_v17 }
 0x572   :  { %v2687_v11 = vpop.eup %2686 }
 0x573   :  { %v2689_v12 = vpop.eup %2688  ;;  %v1371_v15 = vmul.f32 %v2687_v11, %v2685_v8 }
 0x574   :  { %v1370_v20 = vmul.f32 %v2689_v12, %v3208_v24  ;;  %v2691_v33 = vpop.eup %2690 }
 0x576   :  { %v3250_v21 = vadd.f32 %v1371_v15, %v1370_v20 }
 0x578   :  { %2692 = vtanh.f32 %v3250_v21 }
 0x582   :  { %v2693_v34 = vpop.eup %2692 }
 0x583   :  { %v1374_v39 = vmul.f32 %v2693_v34, %v2691_v33 }
 0x585   :  { %1376 = vst [vmem:[#allocation11 + $0x20] sm:$0xff] %v1374_v39  ;;  %1449 = vmatmul.mubr.f32.vlgmr.msra.gmra.mrb[10].mxu0 %v1374_v39  ;;  %1520 = vmatmul.mubr.f32.vlgmr.msra.gmra.mrb[10].mxu1 %v1374_v39 }
 0x586   :  { %2416 = vmatpush1.bf16.msra.mxu0 %v2921_v47  ;;  %2448 = vmatpush1.bf16.msra.mxu1 %v2924_v50 }
 0x587   :  { %2418 = vmatprep.subr.bf16.mxu0 %v2927_v53  ;;  %2450 = vmatprep.subr.bf16.mxu1 %v2929_v56 }
 0x588   :  { %1627 = vmatprep.mubr.f32.mxu0 %v2843_v0  ;;  %1698 = vmatprep.mubr.f32.mxu1 %v2843_v0 }
 0x58a   :  { %2420 = vmatpush1.bf16.msra.mxu0 %v2932_v60  ;;  %2452 = vmatpush1.bf16.msra.mxu1 %v2936_v63 }
 0x58b   :  { %2422 = vmatprep.subr.bf16.mxu0 %v2940_v3  ;;  %2454 = vmatprep.subr.bf16.mxu1 %v2943_v6 }
 0x58e   :  { %2424 = vmatpush1.bf16.msra.mxu0 %v2946_v10  ;;  %2456 = vmatpush1.bf16.msra.mxu1 %v2950_v13 }
 0x58f   :  { %2426 = vmatprep.subr.bf16.mxu0 %v2954_v16  ;;  %2458 = vmatprep.subr.bf16.mxu1 %v2957_v19 }
 0x592   :  { %2428 = vmatpush1.bf16.msra.mxu0 %v2960_v23  ;;  %2460 = vmatpush1.bf16.msra.mxu1 %v2964_v26 }
 0x593   :  { %2430 = vmatprep.subr.bf16.mxu0 %v2968_v29  ;;  %2462 = vmatprep.subr.bf16.mxu1 %v2971_v32 }
 0x596   :  { %2432 = vmatpush1.bf16.msra.mxu0 %v2974_v36  ;;  %2464 = vmatpush1.bf16.msra.mxu1 %v2978_v40 }
 0x597   :  { %2434 = vmatprep.subr.bf16.mxu0 %v2982_v44  ;;  %2466 = vmatprep.subr.bf16.mxu1 %v2985_v48 }
 0x59a   :  { %2436 = vmatpush1.bf16.msra.mxu0 %v2988_v54  ;;  %2468 = vmatpush1.bf16.msra.mxu1 %v2992_v58 }
 0x59b   :  { %2438 = vmatprep.subr.bf16.mxu0 %v2996_v62  ;;  %2470 = vmatprep.subr.bf16.mxu1 %v2999_v4 }
 0x59e   :  { %2440 = vmatpush1.bf16.msra.mxu0 %v3002_v9  ;;  %2472 = vmatpush1.bf16.msra.mxu1 %v3006_v14 }
 0x59f   :  { %2442 = vmatprep.subr.bf16.mxu0 %v3010_v18  ;;  %2474 = vmatprep.subr.bf16.mxu1 %v3013_v22 }
 0x5a2   :  { %2444 = vmatpush1.bf16.msra.mxu0 %v3016_v25  ;;  %2476 = vmatpush1.bf16.msra.mxu1 %v3020_v27 }
 0x5a3   :  { %2478 = vmatprep.subr.bf16.mxu0 %v2917_v38  ;;  %2510 = vmatprep.subr.bf16.mxu1 %v2919_v41 }
 0x658   :  { %v1450_v24 = vpop.f32.mrb[10].mxu0  ;;  %v1521_v28 = vpop.f32.mrb[10].mxu1 }
 0x659   :  { %v2551_v30 = vadd.f32 %v1450_v24, %v3070_v35  ;;  %v1452_v31 = vpop.f32.mrb[11].mxu0  ;;  %v1523_v42 = vpop.f32.mrb[11].mxu1  ;;  %v2567_v52 = vadd.f32 %v1521_v28, %v3079_v1 }
 0x65a   :  { %v2552_v43 = vadd.f32 %v1452_v31, %v3072_v37  ;;  %v2568_v49 = vadd.f32 %v1523_v42, %v3076_v57 }
 0x65b   :  { %v1956_v45 = vmul.f32 -1.442695, %v2551_v30 }
 0x65c   :  { %v1957_v46 = vmul.f32 -1.442695, %v2552_v43  ;;  %v1958_v51 = vmul.f32 -1.442695, %v2568_v49 }
 0x65d   :  { %2694 = vpow2.f32 %v1956_v45 }
 0x65e   :  { %2696 = vpow2.f32 %v1957_v46 }
 0x65f   :  { %2698 = vpow2.f32 %v1958_v51 }
 0x660   :  { %2700 = vtanh.f32 %v2567_v52 }
 0x667   :  { %v2695_v38 = vpop.eup %2694 }
 0x668   :  { %v2697_v55 = vpop.eup %2696  ;;  %v1533_v41 = vadd.f32 1.0, %v2695_v38 }
 0x669   :  { %v1539_v59 = vadd.f32 1.0, %v2697_v55  ;;  %v2699_v61 = vpop.eup %2698 }
 0x66a   :  { %2702 = vrcp.f32 %v1533_v41  ;;  %v2701_v2 = vpop.eup %2700  ;;  %v1546_v11 = vadd.f32 1.0, %v2699_v61 }
 0x66b   :  { %2704 = vrcp.f32 %v1539_v59 }
 0x66c   :  { %2706 = vrcp.f32 %v1546_v11 }
 0x674   :  { %v2703_v5 = vpop.eup %2702 }
 0x675   :  { %v2705_v7 = vpop.eup %2704  ;;  %v1550_v8 = vmul.f32 %v2703_v5, %v2701_v2 }
 0x676   :  { %v1549_v12 = vmul.f32 %v2705_v7, %v3250_v21  ;;  %v2707_v17 = vpop.eup %2706 }
 0x678   :  { %v3292_v15 = vadd.f32 %v1550_v8, %v1549_v12 }
 0x67a   :  { %2708 = vtanh.f32 %v3292_v15 }
 0x684   :  { %v2709_v20 = vpop.eup %2708 }
 0x685   :  { %v1553_v33 = vmul.f32 %v2709_v20, %v2707_v17 }
 0x687   :  { %1555 = vst [vmem:[#allocation11 + $0x28] sm:$0xff] %v1553_v33  ;;  %1628 = vmatmul.mubr.f32.vlgmr.msra.gmra.mrb[12].mxu0 %v1553_v33  ;;  %1699 = vmatmul.mubr.f32.vlgmr.msra.gmra.mrb[12].mxu1 %v1553_v33 }
 0x688   :  { %2480 = vmatpush1.bf16.msra.mxu0 %v2921_v47  ;;  %2512 = vmatpush1.bf16.msra.mxu1 %v2924_v50 }
 0x689   :  { %2482 = vmatprep.subr.bf16.mxu0 %v2927_v53  ;;  %2514 = vmatprep.subr.bf16.mxu1 %v2929_v56 }
 0x68a   :  { %1806 = vmatprep.mubr.f32.mxu0 %v2843_v0  ;;  %1877 = vmatprep.mubr.f32.mxu1 %v2843_v0 }
 0x68c   :  { %2484 = vmatpush1.bf16.msra.mxu0 %v2932_v60  ;;  %2516 = vmatpush1.bf16.msra.mxu1 %v2936_v63 }
 0x68d   :  { %2486 = vmatprep.subr.bf16.mxu0 %v2940_v3  ;;  %2518 = vmatprep.subr.bf16.mxu1 %v2943_v6 }
 0x690   :  { %2488 = vmatpush1.bf16.msra.mxu0 %v2946_v10  ;;  %2520 = vmatpush1.bf16.msra.mxu1 %v2950_v13 }
 0x691   :  { %2490 = vmatprep.subr.bf16.mxu0 %v2954_v16  ;;  %2522 = vmatprep.subr.bf16.mxu1 %v2957_v19 }
 0x694   :  { %2492 = vmatpush1.bf16.msra.mxu0 %v2960_v23  ;;  %2524 = vmatpush1.bf16.msra.mxu1 %v2964_v26 }
 0x695   :  { %2494 = vmatprep.subr.bf16.mxu0 %v2968_v29  ;;  %2526 = vmatprep.subr.bf16.mxu1 %v2971_v32 }
 0x698   :  { %2496 = vmatpush1.bf16.msra.mxu0 %v2974_v36  ;;  %2528 = vmatpush1.bf16.msra.mxu1 %v2978_v40 }
 0x699   :  { %2498 = vmatprep.subr.bf16.mxu0 %v2982_v44  ;;  %2530 = vmatprep.subr.bf16.mxu1 %v2985_v48 }
 0x69c   :  { %2500 = vmatpush1.bf16.msra.mxu0 %v2988_v54  ;;  %2532 = vmatpush1.bf16.msra.mxu1 %v2992_v58 }
 0x69d   :  { %2502 = vmatprep.subr.bf16.mxu0 %v2996_v62  ;;  %2534 = vmatprep.subr.bf16.mxu1 %v2999_v4 }
 0x6a0   :  { %2504 = vmatpush1.bf16.msra.mxu0 %v3002_v9  ;;  %2536 = vmatpush1.bf16.msra.mxu1 %v3006_v14 }
 0x6a1   :  { %2506 = vmatprep.subr.bf16.mxu0 %v3010_v18  ;;  %2538 = vmatprep.subr.bf16.mxu1 %v3013_v22 }
 0x6a4   :  { %2508 = vmatpush1.bf16.msra.mxu0 %v3016_v25  ;;  %2540 = vmatpush1.bf16.msra.mxu1 %v3020_v27 }
 0x75a   :  { %v1629_v0 = vpop.f32.mrb[12].mxu0  ;;  %v1700_v47 = vpop.f32.mrb[12].mxu1 }
 0x75b   :  { %v2553_v50 = vadd.f32 %v1629_v0, %v3070_v35  ;;  %v1631_v53 = vpop.f32.mrb[13].mxu0  ;;  %v1702_v56 = vpop.f32.mrb[13].mxu1  ;;  %v2569_v13 = vadd.f32 %v1700_v47, %v3079_v1 }
 0x75c   :  { %v2554_v60 = vadd.f32 %v1631_v53, %v3072_v37  ;;  %v2570_v6 = vadd.f32 %v1702_v56, %v3076_v57 }
 0x75d   :  { %v1959_v63 = vmul.f32 -1.442695, %v2553_v50 }
 0x75e   :  { %v1960_v3 = vmul.f32 -1.442695, %v2554_v60  ;;  %v1961_v10 = vmul.f32 -1.442695, %v2570_v6 }
 0x75f   :  { %2710 = vpow2.f32 %v1959_v63 }
 0x760   :  { %2712 = vpow2.f32 %v1960_v3 }
 0x761   :  { %2714 = vpow2.f32 %v1961_v10 }
 0x762   :  { %2716 = vtanh.f32 %v2569_v13 }
 0x769   :  { %v2711_v16 = vpop.eup %2710 }
 0x76a   :  { %v2713_v19 = vpop.eup %2712  ;;  %v1712_v23 = vadd.f32 1.0, %v2711_v16 }
 0x76b   :  { %v1718_v26 = vadd.f32 1.0, %v2713_v19  ;;  %v2715_v29 = vpop.eup %2714 }
 0x76c   :  { %2718 = vrcp.f32 %v1712_v23  ;;  %v2717_v32 = vpop.eup %2716  ;;  %v1725_v48 = vadd.f32 1.0, %v2715_v29 }
 0x76d   :  { %2720 = vrcp.f32 %v1718_v26 }
 0x76e   :  { %2722 = vrcp.f32 %v1725_v48 }
 0x776   :  { %v2719_v36 = vpop.eup %2718 }
 0x777   :  { %v2721_v40 = vpop.eup %2720  ;;  %v1729_v44 = vmul.f32 %v2719_v36, %v2717_v32 }
 0x778   :  { %v1728_v54 = vmul.f32 %v2721_v40, %v3292_v15  ;;  %v2723_v62 = vpop.eup %2722 }
 0x77a   :  { %v1730_v58 = vadd.f32 %v1729_v44, %v1728_v54 }
 0x77c   :  { %2724 = vtanh.f32 %v1730_v58 }
 0x786   :  { %v2725_v4 = vpop.eup %2724 }
 0x787   :  { %v1732_v9 = vmul.f32 %v2725_v4, %v2723_v62 }
 0x789   :  { %1734 = vst [vmem:[#allocation11 + $0x30] sm:$0xff] %v1732_v9  ;;  %1807 = vmatmul.mubr.f32.vlgmr.msra.gmra.mrb[14].mxu0 %v1732_v9  ;;  %1878 = vmatmul.mubr.f32.vlgmr.msra.gmra.mrb[14].mxu1 %v1732_v9 }
 0x85c   :  { %v1808_v14 = vpop.f32.mrb[14].mxu0  ;;  %v1879_v18 = vpop.f32.mrb[14].mxu1 }
 0x85d   :  { %v2555_v22 = vadd.f32 %v1808_v14, %v3070_v35  ;;  %v1810_v25 = vpop.f32.mrb[15].mxu0  ;;  %v1881_v27 = vpop.f32.mrb[15].mxu1  ;;  %v2571_v30 = vadd.f32 %v1879_v18, %v3079_v1 }
 0x85e   :  { %v2556_v21 = vadd.f32 %v1810_v25, %v3072_v37  ;;  %v2572_v24 = vadd.f32 %v1881_v27, %v3076_v57 }
 0x85f   :  { %v1962_v34 = vmul.f32 -1.442695, %v2555_v22 }
 0x860   :  { %v1963_v39 = vmul.f32 -1.442695, %v2556_v21  ;;  %v1964_v28 = vmul.f32 -1.442695, %v2572_v24 }
 0x861   :  { %2726 = vpow2.f32 %v1962_v34 }
 0x862   :  { %2728 = vpow2.f32 %v1963_v39 }
 0x863   :  { %2730 = vpow2.f32 %v1964_v28 }
 0x864   :  { %2732 = vtanh.f32 %v2571_v30 }
 0x86b   :  { %v2727_v31 = vpop.eup %2726 }
 0x86c   :  { %v2729_v42 = vpop.eup %2728  ;;  %v1891_v43 = vadd.f32 1.0, %v2727_v31 }
 0x86d   :  { %v1897_v45 = vadd.f32 1.0, %v2729_v42  ;;  %v2731_v35 = vpop.eup %2730 }
 0x86e   :  { %2734 = vrcp.f32 %v1891_v43  ;;  %v2733_v46 = vpop.eup %2732  ;;  %v1904_v52 = vadd.f32 1.0, %v2731_v35 }
 0x86f   :  { %2736 = vrcp.f32 %v1897_v45 }
 0x870   :  { %2738 = vrcp.f32 %v1904_v52 }
 0x878   :  { %v2735_v37 = vpop.eup %2734 }
 0x879   :  { %v2737_v49 = vpop.eup %2736  ;;  %v1908_v51 = vmul.f32 %v2735_v37, %v2733_v46 }
 0x87a   :  { %v1907_v38 = vmul.f32 %v2737_v49, %v1730_v58  ;;  %v2739_v57 = vpop.eup %2738 }
 0x87c   :  { %v1909_v55 = vadd.f32 %v1908_v51, %v1907_v38 }
 0x87e   :  { %2740 = vtanh.f32 %v1909_v55 }
 0x888   :  { %v2741_v1 = vpop.eup %2740 }
 0x889   :  { %v1911_v41 = vmul.f32 %v2741_v1, %v2739_v57 }
 0x88b   :  { %1913 = vst [vmem:[#allocation11 + $0x38] sm:$0xff] %v1911_v41 }
 0x88c   :  { %2819 = shalt.err (!%p2816_p0)
}
 0x88d   :  { %s2820_s6 = scalar_lea.hbm %s3355_s4, 1024 }
 0x88e   :  { %p2821_p1 = scmp.ne.s32.totalorder %s3355_s4, %s2820_s6  ;;  %p2824_p2 = scmp.lt.u32.totalorder %s2820_s6, %s3355_s4 }
 0x890   :  { %p2826_p3 = pnand %p2824_p2, %p2821_p1 }
 0x892   :  { %2829 = shalt.err (!%p2826_p3)
}
 0x893   :  { %1927 = dma.vmem_to_hbm [thread:$0]  %s1922_s26, 1024, %s3355_s4, [#allocation7], %s2840_s1, %s2840_s1, %s2841_s13  }
 0x894   :  { %2834 = dma.done.wait [#allocation7], 1024  }
 0x895   :  { %2835 = vsyncadd [#allocation7], 4294966272 }
 0x896   :  { %1931 = vsyncpa [#allocation6], 1 }
 0x897   :  { %1932 = vsyncpa [#allocation9], 1 }
 0x898   :  { %1933 = vsyncpa [#allocation7], 1 }

</bundles_post_ra>
